<compile_context>
chip_gen: v5e
topology: v5e:2x2
jax: 0.10.0
libtpu: 0.0.40
codegen_flags: <defaults>
</compile_context>

<pallas_src>
import functools

import jax
import jax.numpy as jnp
import numpy as np
from jax.experimental import pallas as pl
from jax.experimental.pallas import tpu as pltpu

MEL_DIM = 80
CONTENT_DIM = 128
SPEAKER_DIM = 64
HIDDEN_DIM = 256

MEL_PAD = 128       # mel channels padded to a full lane tile
SPK_PAD = 128       # speaker channels padded to a full lane tile
M_TARGET = 1024     # target matmul M (rows) per grid step
MAX_ROWS = 2048     # VMEM guard: cap rows per grid step (~12 KiB live per row)


def _round_up(x, m):
    return (x + m - 1) // m * m


def _backend_key():
    try:
        dev = jax.devices()[0]
        return "%s:%s" % (jax.default_backend(), dev.device_kind)
    except Exception:
        return "unknown"


def _is_pre_v6(backend_key):
    k = backend_key.lower()
    return any(tag in k for tag in ("v2", "v3", "v4", "v5"))


# ---------------------------------------------------------------------------
# pltpu.roll probe: sublane (time-axis) rotation is the cheap (XLU) way to
# build the k=3 conv taps.  Probe, per backend and per direction, which
# unit-magnitude static shift reproduces np.roll(x, direction, axis=0);
# fall back to slice+concat shifts if neither works.
# ---------------------------------------------------------------------------
@functools.cache
def _roll_shift_for(direction, backend_key):
    del backend_key  # part of the cache key only
    rows = 32
    x_np = np.tile(np.arange(rows, dtype=np.float32)[:, None], (1, 128))
    want = np.roll(x_np, direction, axis=0)
    for cand in (direction, -direction):
        def _probe(x_ref, o_ref, _s=cand):
            o_ref[...] = pltpu.roll(x_ref[...], shift=_s, axis=0)
        try:
            y = pl.pallas_call(
                _probe,
                out_shape=jax.ShapeDtypeStruct((rows, 128), jnp.float32),
            )(jnp.asarray(x_np))
            if np.array_equal(np.asarray(jax.block_until_ready(y)), want):
                return cand
        except Exception:
            pass
    return None


# ------------------------------ fused kernel --------------------------------

def voice_converter_kernel(src_ref, tgt_ref,
                           ce_w1, ce_b1, ce_w2, ce_b2,
                           se_w1, se_b1,
                           de_w1c, de_w1s, de_b1, de_w2, de_b2,
                           out_ref,
                           *, bg, t_pad, t_real, stack_k, shift_map):
    m = bg * t_pad                        # rows (matmul M) per grid step
    f32 = jnp.float32
    bf16 = jnp.bfloat16

    # ---- segment-local row index + boundary masks, generated in-kernel -----
    local3 = jax.lax.broadcasted_iota(jnp.int32, (bg, t_pad, 1), 1)
    local = local3.reshape(m, 1)
    m_prev = (local != 0).astype(f32)              # x[t-1] exists in segment
    m_next = (local != t_pad - 1).astype(f32)      # x[t+1] exists in segment
    m_first3 = (local3 == 0).astype(f32)           # (bg, t_pad, 1)
    m_last3 = (local3 == t_real - 1).astype(f32)   # (bg, t_pad, 1)
    has_tail = t_real != t_pad                     # static python bool
    if has_tail:
        m_valid = (local < t_real).astype(f32)

    def mask_tail(x):
        # Keep padded tail rows exactly zero so the next conv's x[t+1] tap at
        # the last real row sees the Conv1d zero padding.
        return x * m_valid if has_tail else x

    def shift_rows(x, direction):
        # out[t] = x[t - direction]; wrap rows are zeroed by the caller masks.
        s = shift_map.get(direction)
        if s is not None:
            return pltpu.roll(x, shift=s, axis=0)      # unit-magnitude, XLU
        if direction == 1:
            return jnp.concatenate([x[:1], x[:-1]], axis=0)
        return jnp.concatenate([x[1:], x[-1:]], axis=0)

    def conv3(x, w_ref, b_ref):
        """Conv1d(kernel=3, padding=1), channel-last over the flattened rows."""
        xp = shift_rows(x, +1) * m_prev
        xn = shift_rows(x, -1) * m_next
        if stack_k:
            # Single MXU dot against the host-prestacked [w0; w1; w2] weight.
            xs = jnp.concatenate(
                [xp.astype(bf16), x.astype(bf16), xn.astype(bf16)], axis=-1)
            y = jnp.dot(xs, w_ref[...], preferred_element_type=f32)
        else:
            y = (jnp.dot(xp.astype(bf16), w_ref[0], preferred_element_type=f32)
                 + jnp.dot(x.astype(bf16), w_ref[1], preferred_element_type=f32)
                 + jnp.dot(xn.astype(bf16), w_ref[2], preferred_element_type=f32))
        return y + b_ref[...]

    # TODO(synk): on v6e/v7x the f32 upcast of src/tgt could be dropped
    # (bf16 taps + select masks); kept f32 here as the generation-safe path.
    src = src_ref[...].astype(f32)                     # (M, 128)
    tgt = tgt_ref[...].astype(f32)                     # (M, 128)

    # ---- ContentEncoder ----------------------------------------------------
    h = mask_tail(jnp.maximum(conv3(src, ce_w1, ce_b1), 0.0))        # (M, 256)
    content = mask_tail(jnp.maximum(conv3(h, ce_w2, ce_b2), 0.0))    # (M, 128)

    # ---- SpeakerEncoder: ReLU(conv) -> per-utterance temporal mean ---------
    s = mask_tail(jnp.maximum(conv3(tgt, se_w1, se_b1), 0.0))        # (M, 128)
    spk = jnp.sum(s.reshape(bg, t_pad, s.shape[-1]), axis=1) * (1.0 / t_real)

    # ---- VoiceDecoder layer 1 ----------------------------------------------
    # content taps (MXU) + factored, time-invariant speaker contribution via a
    # single packed GEMM: lanes of cc = [base=w0+w1+w2 | c0=w0 | c2=w2] @ spk.
    d_pre = conv3(content, de_w1c, de_b1)                            # (M, 256)
    cc = jnp.dot(spk.astype(bf16), de_w1s[...], preferred_element_type=f32)
    hdim = d_pre.shape[-1]
    base = cc[:, :hdim]
    c0 = cc[:, hdim:2 * hdim]
    c2 = cc[:, 2 * hdim:]
    # Conv zero padding: row 0 misses the W_spk[0] tap, row T-1 misses W_spk[2].
    spk_term = (base[:, None, :]
                - m_first3 * c0[:, None, :]
                - m_last3 * c2[:, None, :]).reshape(m, hdim)         # (M, 256)
    d = mask_tail(jnp.maximum(d_pre + spk_term, 0.0))                # (M, 256)

    # ---- VoiceDecoder layer 2 (output lanes padded to 128 -> dense store) --
    out_ref[...] = conv3(d, de_w2, de_b2).astype(out_ref.dtype)      # (M, 128)


# -------------------------------- wrapper ------------------------------------

def _pad_to(a, shape):
    return jnp.pad(a, [(0, s - d) for d, s in zip(a.shape, shape)])


def voice_converter_forward(source_mel, target_mel, params):
    """source_mel, target_mel: (B, mel_dim, T) float32 (PyTorch NCT layout)."""
    B, C, T = source_mel.shape
    assert C == MEL_DIM and target_mel.shape == source_mel.shape

    # Static tiling: fold batch elements until each grid step's matmul M
    # dimension reaches ~M_TARGET rows, but (a) keep at least 2 grid steps
    # whenever B >= 2 so both v7x TensorCores get work, and (b) respect a
    # rows-per-step VMEM budget.
    t_pad = _round_up(T, 8)
    bg = max(1, min(B, M_TARGET // t_pad, MAX_ROWS // t_pad))
    num_groups = -(-B // bg)
    if num_groups < 2 and B >= 2:
        bg = -(-B // 2)
        num_groups = -(-B // bg)
    b_pad = num_groups * bg
    m = bg * t_pad
    # TODO(synk): T-tiled variant (conv halo + two-phase speaker mean) for
    # utterances whose t_pad alone exceeds the VMEM row budget.

    backend_key = _backend_key()
    stack_k = not _is_pre_v6(backend_key)          # K-stack taps on v6e/v7x
    shift_map = {d: _roll_shift_for(d, backend_key) for d in (1, -1)}

    # Activations: NCT -> channel-last, zero-pad (batch, time, lanes), flatten
    # (batch, time) into the matmul M axis, cast to bf16 for the MXU / DMA.
    def prep(x):
        x = jnp.transpose(x, (0, 2, 1))                        # (B, T, 80)
        x = jnp.pad(x, ((0, b_pad - B), (0, t_pad - T), (0, MEL_PAD - C)))
        return x.reshape(b_pad * t_pad, MEL_PAD).astype(jnp.bfloat16)

    src = prep(source_mel)
    tgt = prep(target_mel)

    # Weights: lane-pad to 128 multiples, optionally K-stack the taps, split
    # de_w1 into content / packed-speaker parts, cast MXU operands to bf16.
    p = params

    def stack(w):                                   # (3, Cin, Cout) -> (3*Cin, Cout)
        return w.reshape(w.shape[0] * w.shape[1], w.shape[2])

    ce_w1 = _pad_to(p["ce_w1"], (3, MEL_PAD, HIDDEN_DIM))
    ce_w2 = p["ce_w2"]
    se_w1 = _pad_to(p["se_w1"], (3, MEL_PAD, SPK_PAD))
    de_w1c = p["de_w1"][:, :CONTENT_DIM, :]
    de_w2 = _pad_to(p["de_w2"], (3, HIDDEN_DIM, MEL_PAD))
    if stack_k:
        ce_w1, ce_w2, se_w1, de_w1c, de_w2 = (
            stack(w) for w in (ce_w1, ce_w2, se_w1, de_w1c, de_w2))
    ce_w1, ce_w2, se_w1, de_w1c, de_w2 = (
        w.astype(jnp.bfloat16) for w in (ce_w1, ce_w2, se_w1, de_w1c, de_w2))

    w_s = _pad_to(p["de_w1"][:, CONTENT_DIM:, :], (3, SPK_PAD, HIDDEN_DIM))
    de_w1s = jnp.concatenate(
        [w_s[0] + w_s[1] + w_s[2], w_s[0], w_s[2]],
        axis=-1).astype(jnp.bfloat16)               # (128, 3*HIDDEN) packed

    ce_b1 = p["ce_b1"]
    ce_b2 = p["ce_b2"]
    se_b1 = _pad_to(p["se_b1"], (1, SPK_PAD))
    de_b1 = p["de_b1"]
    de_b2 = _pad_to(p["de_b2"], (1, MEL_PAD))

    weight_args = [ce_w1, ce_b1, ce_w2, ce_b2, se_w1, se_b1,
                   de_w1c, de_w1s, de_b1, de_w2, de_b2]

    def const_spec(a):                 # block-index-invariant (weights/biases)
        nd = a.ndim
        return pl.BlockSpec(a.shape, lambda g, _nd=nd: (0,) * _nd)

    act_spec = pl.BlockSpec((m, MEL_PAD), lambda g: (g, 0))

    kernel = functools.partial(
        voice_converter_kernel, bg=bg, t_pad=t_pad, t_real=T,
        stack_k=stack_k, shift_map=shift_map)

    # VMEM budget: ~12 KiB of live intermediates per row + fixed headroom,
    # clamped so typical shapes stay inside v7x's 64 MiB per-core VMEM.
    row_bytes = 12 * 1024
    vmem_limit = int(max(32 * 2**20, min(100 * 2**20, m * row_bytes + 8 * 2**20)))

    out_flat = pl.pallas_call(
        kernel,
        out_shape=jax.ShapeDtypeStruct((b_pad * t_pad, MEL_PAD), jnp.float32),
        grid_spec=pltpu.PrefetchScalarGridSpec(
            num_scalar_prefetch=0,
            grid=(num_groups,),
            in_specs=[act_spec, act_spec] + [const_spec(a) for a in weight_args],
            out_specs=pl.BlockSpec((m, MEL_PAD), lambda g: (g, 0)),
        ),
        compiler_params=pltpu.CompilerParams(
            dimension_semantics=("parallel",),
            vmem_limit_bytes=vmem_limit),
    )(src, tgt, *weight_args)

    # Un-pad and return in PyTorch NCT layout.
    out = out_flat.reshape(b_pad, t_pad, MEL_PAD)[:B, :T, :MEL_DIM]
    return jnp.transpose(out, (0, 2, 1))


# --------------------------- params / reference ------------------------------

PARAM_SHAPES = {
    "ce_w1": (3, MEL_DIM, HIDDEN_DIM),
    "ce_b1": (1, HIDDEN_DIM),
    "ce_w2": (3, HIDDEN_DIM, CONTENT_DIM),
    "ce_b2": (1, CONTENT_DIM),
    "se_w1": (3, MEL_DIM, SPEAKER_DIM),
    "se_b1": (1, SPEAKER_DIM),
    "de_w1": (3, CONTENT_DIM + SPEAKER_DIM, HIDDEN_DIM),
    "de_b1": (1, HIDDEN_DIM),
    "de_w2": (3, HIDDEN_DIM, MEL_DIM),
    "de_b2": (1, MEL_DIM),
}


def init_params(key):
    scale = 0.05
    keys = jax.random.split(key, len(PARAM_SHAPES))
    return {name: scale * jax.random.normal(k, shp, dtype=jnp.float32)
            for (name, shp), k in zip(PARAM_SHAPES.items(), keys)}


def _conv1d_ref(x, w, b):
    # x: (B, T, Cin), w: (3, Cin, Cout), b: (1, Cout)
    zero = jnp.zeros_like(x[:, :1, :])
    xp = jnp.concatenate([zero, x[:, :-1, :]], axis=1)
    xn = jnp.concatenate([x[:, 1:, :], zero], axis=1)
    return xp @ w[0] + x @ w[1] + xn @ w[2] + b


def forward_ref(source_mel, target_mel, p):
    s = jnp.transpose(source_mel, (0, 2, 1))
    t = jnp.transpose(target_mel, (0, 2, 1))
    h = jax.nn.relu(_conv1d_ref(s, p["ce_w1"], p["ce_b1"]))
    c = jax.nn.relu(_conv1d_ref(h, p["ce_w2"], p["ce_b2"]))
    spk = jax.nn.relu(_conv1d_ref(t, p["se_w1"], p["se_b1"])).mean(axis=1, keepdims=True)
    z = jnp.concatenate(
        [c, jnp.broadcast_to(spk, (c.shape[0], c.shape[1], spk.shape[2]))], axis=-1)
    d = jax.nn.relu(_conv1d_ref(z, p["de_w1"], p["de_b1"]))
    o = _conv1d_ref(d, p["de_w2"], p["de_b2"])
    return jnp.transpose(o, (0, 2, 1))


# ---------------------------------- main --------------------------------------

if __name__ == "__main__":
    key = jax.random.PRNGKey(0)
    k_p, k_src, k_tgt = jax.random.split(key, 3)

    B, T = 2, 16
    params = init_params(k_p)
    source_mel = jax.random.normal(k_src, (B, MEL_DIM, T), dtype=jnp.float32)
    target_mel = jax.random.normal(k_tgt, (B, MEL_DIM, T), dtype=jnp.float32)

    out = jax.block_until_ready(
        voice_converter_forward(source_mel, target_mel, params))
    ref = jax.block_until_ready(forward_ref(source_mel, target_mel, params))

    assert out.shape == (B, MEL_DIM, T)
    # bf16 MXU operands (f32 accumulation) -> relaxed tolerance vs f32 reference.
    assert jnp.allclose(out, ref, atol=5e-2, rtol=5e-2), (
        "mismatch vs JAX reference, max abs err = %f"
        % float(jnp.max(jnp.abs(out - ref))))

    print("KERNEL_OK")
</pallas_src>

<mosaic_0001>
module attributes {stable_mosaic.version = 11 : i64} {
  func.func @_probe(%arg0: memref<32x128xf32, #tpu.memory_space<vmem>>, %arg1: memref<32x128xf32, #tpu.memory_space<vmem>>) attributes {dimension_semantics = [], scalar_prefetch = 0 : i64, scratch_operands = 0 : i64, tpu.core_type = #tpu.core_type<tc>} {
    %c0 = arith.constant 0 : index
    %c0_0 = arith.constant 0 : index
    %0 = vector.load %arg0[%c0, %c0_0] : memref<32x128xf32, #tpu.memory_space<vmem>>, vector<32x128xf32>
    %c1_i32 = arith.constant 1 : i32
    %1 = tpu.dynamic_rotate %0 by %c1_i32 dim 0 : vector<32x128xf32>, i32 -> vector<32x128xf32>
    %c0_1 = arith.constant 0 : index
    %c0_2 = arith.constant 0 : index
    %2 = vector.load %arg1[%c0_1, %c0_2] : memref<32x128xf32, #tpu.memory_space<vmem>>, vector<32x128xf32>
    tpu.vector_store %arg1[%c0_1, %c0_2], %1 {strides = array<i32>} : memref<32x128xf32, #tpu.memory_space<vmem>>, vector<32x128xf32>,
    return
  }
}

module attributes {stable_mosaic.version = 11 : i64} {
  func.func @_probe(%arg0: memref<32x128xf32, #tpu.memory_space<vmem>>, %arg1: memref<32x128xf32, #tpu.memory_space<vmem>>) attributes {dimension_semantics = [], scalar_prefetch = 0 : i64, scratch_operands = 0 : i64, tpu.core_type = #tpu.core_type<tc>} {
    %c0 = arith.constant 0 : index
    %c0_0 = arith.constant 0 : index
    %0 = vector.load %arg0[%c0, %c0_0] : memref<32x128xf32, #tpu.memory_space<vmem>>, vector<32x128xf32>
    %c1_i32 = arith.constant 1 : i32
    %1 = tpu.dynamic_rotate %0 by %c1_i32 dim 0 : vector<32x128xf32>, i32 -> vector<32x128xf32>
    %c0_1 = arith.constant 0 : index
    %c0_2 = arith.constant 0 : index
    %2 = vector.load %arg1[%c0_1, %c0_2] : memref<32x128xf32, #tpu.memory_space<vmem>>, vector<32x128xf32>
    tpu.vector_store %arg1[%c0_1, %c0_2], %1 {strides = array<i32>} : memref<32x128xf32, #tpu.memory_space<vmem>>, vector<32x128xf32>,
    return
  }
}

module attributes {stable_mosaic.version = 11 : i64} {
  func.func @voice_converter_kernel(%arg0: i32, %arg1: memref<16x128xbf16, #tpu.memory_space<vmem>>, %arg2: memref<16x128xbf16, #tpu.memory_space<vmem>>, %arg3: memref<384x256xbf16, #tpu.memory_space<vmem>>, %arg4: memref<1x256xf32, #tpu.memory_space<vmem>>, %arg5: memref<768x128xbf16, #tpu.memory_space<vmem>>, %arg6: memref<1x128xf32, #tpu.memory_space<vmem>>, %arg7: memref<384x128xbf16, #tpu.memory_space<vmem>>, %arg8: memref<1x128xf32, #tpu.memory_space<vmem>>, %arg9: memref<384x256xbf16, #tpu.memory_space<vmem>>, %arg10: memref<128x768xbf16, #tpu.memory_space<vmem>>, %arg11: memref<1x256xf32, #tpu.memory_space<vmem>>, %arg12: memref<768x128xbf16, #tpu.memory_space<vmem>>, %arg13: memref<1x128xf32, #tpu.memory_space<vmem>>, %arg14: memref<16x128xf32, #tpu.memory_space<vmem>>) attributes {dimension_semantics = [#tpu.dimension_semantics<parallel>], iteration_bounds = array<i64: 2>, scalar_prefetch = 0 : i64, scratch_operands = 0 : i64, tpu.core_type = #tpu.core_type<tc>, window_params = [{transform_indices = @transform_0, window_bounds = array<i64: 16, 128>}, {transform_indices = @transform_1, window_bounds = array<i64: 16, 128>}, {pipeline_mode = #tpu.pipeline_mode<synchronous>, transform_indices = @transform_2, window_bounds = array<i64: 384, 256>}, {pipeline_mode = #tpu.pipeline_mode<synchronous>, transform_indices = @transform_3, window_bounds = array<i64: 1, 256>}, {pipeline_mode = #tpu.pipeline_mode<synchronous>, transform_indices = @transform_4, window_bounds = array<i64: 768, 128>}, {pipeline_mode = #tpu.pipeline_mode<synchronous>, transform_indices = @transform_5, window_bounds = array<i64: 1, 128>}, {pipeline_mode = #tpu.pipeline_mode<synchronous>, transform_indices = @transform_6, window_bounds = array<i64: 384, 128>}, {pipeline_mode = #tpu.pipeline_mode<synchronous>, transform_indices = @transform_7, window_bounds = array<i64: 1, 128>}, {pipeline_mode = #tpu.pipeline_mode<synchronous>, transform_indices = @transform_8, window_bounds = array<i64: 384, 256>}, {pipeline_mode = #tpu.pipeline_mode<synchronous>, transform_indices = @transform_9, window_bounds = array<i64: 128, 768>}, {pipeline_mode = #tpu.pipeline_mode<synchronous>, transform_indices = @transform_10, window_bounds = array<i64: 1, 256>}, {pipeline_mode = #tpu.pipeline_mode<synchronous>, transform_indices = @transform_11, window_bounds = array<i64: 768, 128>}, {pipeline_mode = #tpu.pipeline_mode<synchronous>, transform_indices = @transform_12, window_bounds = array<i64: 1, 128>}, {transform_indices = @transform_13, window_bounds = array<i64: 16, 128>}]} {
    %0 = tpu.iota {dimensions = array<i32: 1>} : vector<1x16x1xi32>
    %1 = vector.shape_cast %0 : vector<1x16x1xi32> to vector<16x1xi32>
    %c0_i32 = arith.constant 0 : i32
    %2 = vector.broadcast %c0_i32 : i32 to vector<16x1xi32>
    %3 = arith.cmpi ne, %1, %2 : vector<16x1xi32>
    %4 = arith.extui %3 : vector<16x1xi1> to vector<16x1xi32>
    %5 = arith.sitofp %4 : vector<16x1xi32> to vector<16x1xf32>
    %c15_i32 = arith.constant 15 : i32
    %6 = vector.broadcast %c15_i32 : i32 to vector<16x1xi32>
    %7 = arith.cmpi ne, %1, %6 : vector<16x1xi32>
    %8 = arith.extui %7 : vector<16x1xi1> to vector<16x1xi32>
    %9 = arith.sitofp %8 : vector<16x1xi32> to vector<16x1xf32>
    %c0_i32_0 = arith.constant 0 : i32
    %10 = vector.broadcast %c0_i32_0 : i32 to vector<1x16x1xi32>
    %11 = arith.cmpi eq, %0, %10 : vector<1x16x1xi32>
    %12 = arith.extui %11 : vector<1x16x1xi1> to vector<1x16x1xi32>
    %13 = arith.sitofp %12 : vector<1x16x1xi32> to vector<1x16x1xf32>
    %c15_i32_1 = arith.constant 15 : i32
    %14 = vector.broadcast %c15_i32_1 : i32 to vector<1x16x1xi32>
    %15 = arith.cmpi eq, %0, %14 : vector<1x16x1xi32>
    %16 = arith.extui %15 : vector<1x16x1xi1> to vector<1x16x1xi32>
    %17 = arith.sitofp %16 : vector<1x16x1xi32> to vector<1x16x1xf32>
    %c0 = arith.constant 0 : index
    %c0_2 = arith.constant 0 : index
    %18 = vector.load %arg1[%c0, %c0_2] : memref<16x128xbf16, #tpu.memory_space<vmem>>, vector<16x128xbf16>
    %19 = arith.extf %18 : vector<16x128xbf16> to vector<16x128xf32>
    %c0_3 = arith.constant 0 : index
    %c0_4 = arith.constant 0 : index
    %20 = vector.load %arg2[%c0_3, %c0_4] : memref<16x128xbf16, #tpu.memory_space<vmem>>, vector<16x128xbf16>
    %21 = arith.extf %20 : vector<16x128xbf16> to vector<16x128xf32>
    %22 = vector.extract_strided_slice %19 {offsets = [0, 0], sizes = [1, 128], strides = [1, 1]} : vector<16x128xf32> to vector<1x128xf32>
    %23 = vector.extract_strided_slice %19 {offsets = [0, 0], sizes = [15, 128], strides = [1, 1]} : vector<16x128xf32> to vector<15x128xf32>
    %24 = tpu.concatenate %22, %23 in 0 : vector<1x128xf32>, vector<15x128xf32> -> vector<16x128xf32>
    %25 = vector.broadcast %5 : vector<16x1xf32> to vector<16x128xf32>
    %26 = arith.mulf %24, %25 : vector<16x128xf32>
    %27 = vector.extract_strided_slice %19 {offsets = [1, 0], sizes = [15, 128], strides = [1, 1]} : vector<16x128xf32> to vector<15x128xf32>
    %28 = vector.extract_strided_slice %19 {offsets = [15, 0], sizes = [1, 128], strides = [1, 1]} : vector<16x128xf32> to vector<1x128xf32>
    %29 = tpu.concatenate %27, %28 in 0 : vector<15x128xf32>, vector<1x128xf32> -> vector<16x128xf32>
    %30 = vector.broadcast %9 : vector<16x1xf32> to vector<16x128xf32>
    %31 = arith.mulf %29, %30 : vector<16x128xf32>
    %32 = arith.truncf %26 : vector<16x128xf32> to vector<16x128xbf16>
    %33 = arith.truncf %19 : vector<16x128xf32> to vector<16x128xbf16>
    %34 = arith.truncf %31 : vector<16x128xf32> to vector<16x128xbf16>
    %35 = tpu.concatenate %32, %33, %34 in 1 : vector<16x128xbf16>, vector<16x128xbf16>, vector<16x128xbf16> -> vector<16x384xbf16>
    %c0_5 = arith.constant 0 : index
    %c0_6 = arith.constant 0 : index
    %36 = vector.load %arg3[%c0_5, %c0_6] : memref<384x256xbf16, #tpu.memory_space<vmem>>, vector<384x256xbf16>
    %cst = arith.constant dense<0.000000e+00> : vector<16x256xf32>
    %37 = tpu.matmul %35, %36, %cst {dimension_numbers = #tpu.dot_dimension_numbers<[1], [0], [0], [1], [0, 0, 1, 1], [], []>} : vector<16x384xbf16>, vector<384x256xbf16>, vector<16x256xf32> -> vector<16x256xf32>
    %c0_7 = arith.constant 0 : index
    %c0_8 = arith.constant 0 : index
    %38 = vector.load %arg4[%c0_7, %c0_8] : memref<1x256xf32, #tpu.memory_space<vmem>>, vector<1x256xf32>
    %39 = vector.broadcast %38 : vector<1x256xf32> to vector<16x256xf32>
    %40 = arith.addf %37, %39 : vector<16x256xf32>
    %cst_9 = arith.constant 0.000000e+00 : f32
    %41 = vector.broadcast %cst_9 : f32 to vector<16x256xf32>
    %42 = arith.maximumf %40, %41 : vector<16x256xf32>
    %43 = vector.extract_strided_slice %42 {offsets = [0, 0], sizes = [1, 256], strides = [1, 1]} : vector<16x256xf32> to vector<1x256xf32>
    %44 = vector.extract_strided_slice %42 {offsets = [0, 0], sizes = [15, 256], strides = [1, 1]} : vector<16x256xf32> to vector<15x256xf32>
    %45 = tpu.concatenate %43, %44 in 0 : vector<1x256xf32>, vector<15x256xf32> -> vector<16x256xf32>
    %46 = vector.broadcast %5 : vector<16x1xf32> to vector<16x256xf32>
    %47 = arith.mulf %45, %46 : vector<16x256xf32>
    %48 = vector.extract_strided_slice %42 {offsets = [1, 0], sizes = [15, 256], strides = [1, 1]} : vector<16x256xf32> to vector<15x256xf32>
    %49 = vector.extract_strided_slice %42 {offsets = [15, 0], sizes = [1, 256], strides = [1, 1]} : vector<16x256xf32> to vector<1x256xf32>
    %50 = tpu.concatenate %48, %49 in 0 : vector<15x256xf32>, vector<1x256xf32> -> vector<16x256xf32>
    %51 = vector.broadcast %9 : vector<16x1xf32> to vector<16x256xf32>
    %52 = arith.mulf %50, %51 : vector<16x256xf32>
    %53 = arith.truncf %47 : vector<16x256xf32> to vector<16x256xbf16>
    %54 = arith.truncf %42 : vector<16x256xf32> to vector<16x256xbf16>
    %55 = arith.truncf %52 : vector<16x256xf32> to vector<16x256xbf16>
    %56 = tpu.concatenate %53, %54, %55 in 1 : vector<16x256xbf16>, vector<16x256xbf16>, vector<16x256xbf16> -> vector<16x768xbf16>
    %c0_10 = arith.constant 0 : index
    %c0_11 = arith.constant 0 : index
    %57 = vector.load %arg5[%c0_10, %c0_11] : memref<768x128xbf16, #tpu.memory_space<vmem>>, vector<768x128xbf16>
    %cst_12 = arith.constant dense<0.000000e+00> : vector<16x128xf32>
    %58 = tpu.matmul %56, %57, %cst_12 {dimension_numbers = #tpu.dot_dimension_numbers<[1], [0], [0], [1], [0, 0, 1, 1], [], []>} : vector<16x768xbf16>, vector<768x128xbf16>, vector<16x128xf32> -> vector<16x128xf32>
    %c0_13 = arith.constant 0 : index
    %c0_14 = arith.constant 0 : index
    %59 = vector.load %arg6[%c0_13, %c0_14] : memref<1x128xf32, #tpu.memory_space<vmem>>, vector<1x128xf32>
    %60 = vector.broadcast %59 : vector<1x128xf32> to vector<16x128xf32>
    %61 = arith.addf %58, %60 : vector<16x128xf32>
    %cst_15 = arith.constant 0.000000e+00 : f32
    %62 = vector.broadcast %cst_15 : f32 to vector<16x128xf32>
    %63 = arith.maximumf %61, %62 : vector<16x128xf32>
    %64 = vector.extract_strided_slice %21 {offsets = [0, 0], sizes = [1, 128], strides = [1, 1]} : vector<16x128xf32> to vector<1x128xf32>
    %65 = vector.extract_strided_slice %21 {offsets = [0, 0], sizes = [15, 128], strides = [1, 1]} : vector<16x128xf32> to vector<15x128xf32>
    %66 = tpu.concatenate %64, %65 in 0 : vector<1x128xf32>, vector<15x128xf32> -> vector<16x128xf32>
    %67 = vector.broadcast %5 : vector<16x1xf32> to vector<16x128xf32>
    %68 = arith.mulf %66, %67 : vector<16x128xf32>
    %69 = vector.extract_strided_slice %21 {offsets = [1, 0], sizes = [15, 128], strides = [1, 1]} : vector<16x128xf32> to vector<15x128xf32>
    %70 = vector.extract_strided_slice %21 {offsets = [15, 0], sizes = [1, 128], strides = [1, 1]} : vector<16x128xf32> to vector<1x128xf32>
    %71 = tpu.concatenate %69, %70 in 0 : vector<15x128xf32>, vector<1x128xf32> -> vector<16x128xf32>
    %72 = vector.broadcast %9 : vector<16x1xf32> to vector<16x128xf32>
    %73 = arith.mulf %71, %72 : vector<16x128xf32>
    %74 = arith.truncf %68 : vector<16x128xf32> to vector<16x128xbf16>
    %75 = arith.truncf %21 : vector<16x128xf32> to vector<16x128xbf16>
    %76 = arith.truncf %73 : vector<16x128xf32> to vector<16x128xbf16>
    %77 = tpu.concatenate %74, %75, %76 in 1 : vector<16x128xbf16>, vector<16x128xbf16>, vector<16x128xbf16> -> vector<16x384xbf16>
    %c0_16 = arith.constant 0 : index
    %c0_17 = arith.constant 0 : index
    %78 = vector.load %arg7[%c0_16, %c0_17] : memref<384x128xbf16, #tpu.memory_space<vmem>>, vector<384x128xbf16>
    %cst_18 = arith.constant dense<0.000000e+00> : vector<16x128xf32>
    %79 = tpu.matmul %77, %78, %cst_18 {dimension_numbers = #tpu.dot_dimension_numbers<[1], [0], [0], [1], [0, 0, 1, 1], [], []>} : vector<16x384xbf16>, vector<384x128xbf16>, vector<16x128xf32> -> vector<16x128xf32>
    %c0_19 = arith.constant 0 : index
    %c0_20 = arith.constant 0 : index
    %80 = vector.load %arg8[%c0_19, %c0_20] : memref<1x128xf32, #tpu.memory_space<vmem>>, vector<1x128xf32>
    %81 = vector.broadcast %80 : vector<1x128xf32> to vector<16x128xf32>
    %82 = arith.addf %79, %81 : vector<16x128xf32>
    %cst_21 = arith.constant 0.000000e+00 : f32
    %83 = vector.broadcast %cst_21 : f32 to vector<16x128xf32>
    %84 = arith.maximumf %82, %83 : vector<16x128xf32>
    %85 = vector.shape_cast %84 : vector<16x128xf32> to vector<1x16x128xf32>
    %cst_22 = arith.constant dense<0.000000e+00> : vector<1x128xf32>
    %86 = vector.multi_reduction <add>, %85, %cst_22 [1] : vector<1x16x128xf32> to vector<1x128xf32>
    %cst_23 = arith.constant 6.250000e-02 : f32
    %87 = vector.broadcast %cst_23 : f32 to vector<1x128xf32>
    %88 = arith.mulf %86, %87 : vector<1x128xf32>
    %89 = vector.extract_strided_slice %63 {offsets = [0, 0], sizes = [1, 128], strides = [1, 1]} : vector<16x128xf32> to vector<1x128xf32>
    %90 = vector.extract_strided_slice %63 {offsets = [0, 0], sizes = [15, 128], strides = [1, 1]} : vector<16x128xf32> to vector<15x128xf32>
    %91 = tpu.concatenate %89, %90 in 0 : vector<1x128xf32>, vector<15x128xf32> -> vector<16x128xf32>
    %92 = vector.broadcast %5 : vector<16x1xf32> to vector<16x128xf32>
    %93 = arith.mulf %91, %92 : vector<16x128xf32>
    %94 = vector.extract_strided_slice %63 {offsets = [1, 0], sizes = [15, 128], strides = [1, 1]} : vector<16x128xf32> to vector<15x128xf32>
    %95 = vector.extract_strided_slice %63 {offsets = [15, 0], sizes = [1, 128], strides = [1, 1]} : vector<16x128xf32> to vector<1x128xf32>
    %96 = tpu.concatenate %94, %95 in 0 : vector<15x128xf32>, vector<1x128xf32> -> vector<16x128xf32>
    %97 = vector.broadcast %9 : vector<16x1xf32> to vector<16x128xf32>
    %98 = arith.mulf %96, %97 : vector<16x128xf32>
    %99 = arith.truncf %93 : vector<16x128xf32> to vector<16x128xbf16>
    %100 = arith.truncf %63 : vector<16x128xf32> to vector<16x128xbf16>
    %101 = arith.truncf %98 : vector<16x128xf32> to vector<16x128xbf16>
    %102 = tpu.concatenate %99, %100, %101 in 1 : vector<16x128xbf16>, vector<16x128xbf16>, vector<16x128xbf16> -> vector<16x384xbf16>
    %c0_24 = arith.constant 0 : index
    %c0_25 = arith.constant 0 : index
    %103 = vector.load %arg9[%c0_24, %c0_25] : memref<384x256xbf16, #tpu.memory_space<vmem>>, vector<384x256xbf16>
    %cst_26 = arith.constant dense<0.000000e+00> : vector<16x256xf32>
    %104 = tpu.matmul %102, %103, %cst_26 {dimension_numbers = #tpu.dot_dimension_numbers<[1], [0], [0], [1], [0, 0, 1, 1], [], []>} : vector<16x384xbf16>, vector<384x256xbf16>, vector<16x256xf32> -> vector<16x256xf32>
    %c0_27 = arith.constant 0 : index
    %c0_28 = arith.constant 0 : index
    %105 = vector.load %arg11[%c0_27, %c0_28] : memref<1x256xf32, #tpu.memory_space<vmem>>, vector<1x256xf32>
    %106 = vector.broadcast %105 : vector<1x256xf32> to vector<16x256xf32>
    %107 = arith.addf %104, %106 : vector<16x256xf32>
    %108 = arith.truncf %88 : vector<1x128xf32> to vector<1x128xbf16>
    %c0_29 = arith.constant 0 : index
    %c0_30 = arith.constant 0 : index
    %109 = vector.load %arg10[%c0_29, %c0_30] : memref<128x768xbf16, #tpu.memory_space<vmem>>, vector<128x768xbf16>
    %cst_31 = arith.constant dense<0.000000e+00> : vector<1x768xf32>
    %110 = tpu.matmul %108, %109, %cst_31 {dimension_numbers = #tpu.dot_dimension_numbers<[1], [0], [0], [1], [0, 0, 1, 1], [], []>} : vector<1x128xbf16>, vector<128x768xbf16>, vector<1x768xf32> -> vector<1x768xf32>
    %111 = vector.extract_strided_slice %110 {offsets = [0, 0], sizes = [1, 256], strides = [1, 1]} : vector<1x768xf32> to vector<1x256xf32>
    %112 = vector.extract_strided_slice %110 {offsets = [0, 256], sizes = [1, 256], strides = [1, 1]} : vector<1x768xf32> to vector<1x256xf32>
    %113 = vector.extract_strided_slice %110 {offsets = [0, 512], sizes = [1, 256], strides = [1, 1]} : vector<1x768xf32> to vector<1x256xf32>
    %114 = vector.shape_cast %111 : vector<1x256xf32> to vector<1x1x256xf32>
    %115 = vector.shape_cast %112 : vector<1x256xf32> to vector<1x1x256xf32>
    %116 = vector.broadcast %13 : vector<1x16x1xf32> to vector<1x16x256xf32>
    %117 = vector.broadcast %115 : vector<1x1x256xf32> to vector<1x16x256xf32>
    %118 = arith.mulf %116, %117 : vector<1x16x256xf32>
    %119 = vector.broadcast %114 : vector<1x1x256xf32> to vector<1x16x256xf32>
    %120 = arith.subf %119, %118 : vector<1x16x256xf32>
    %121 = vector.shape_cast %113 : vector<1x256xf32> to vector<1x1x256xf32>
    %122 = vector.broadcast %17 : vector<1x16x1xf32> to vector<1x16x256xf32>
    %123 = vector.broadcast %121 : vector<1x1x256xf32> to vector<1x16x256xf32>
    %124 = arith.mulf %122, %123 : vector<1x16x256xf32>
    %125 = arith.subf %120, %124 : vector<1x16x256xf32>
    %126 = vector.shape_cast %125 : vector<1x16x256xf32> to vector<16x256xf32>
    %127 = arith.addf %107, %126 : vector<16x256xf32>
    %cst_32 = arith.constant 0.000000e+00 : f32
    %128 = vector.broadcast %cst_32 : f32 to vector<16x256xf32>
    %129 = arith.maximumf %127, %128 : vector<16x256xf32>
    %130 = vector.extract_strided_slice %129 {offsets = [0, 0], sizes = [1, 256], strides = [1, 1]} : vector<16x256xf32> to vector<1x256xf32>
    %131 = vector.extract_strided_slice %129 {offsets = [0, 0], sizes = [15, 256], strides = [1, 1]} : vector<16x256xf32> to vector<15x256xf32>
    %132 = tpu.concatenate %130, %131 in 0 : vector<1x256xf32>, vector<15x256xf32> -> vector<16x256xf32>
    %133 = vector.broadcast %5 : vector<16x1xf32> to vector<16x256xf32>
    %134 = arith.mulf %132, %133 : vector<16x256xf32>
    %135 = vector.extract_strided_slice %129 {offsets = [1, 0], sizes = [15, 256], strides = [1, 1]} : vector<16x256xf32> to vector<15x256xf32>
    %136 = vector.extract_strided_slice %129 {offsets = [15, 0], sizes = [1, 256], strides = [1, 1]} : vector<16x256xf32> to vector<1x256xf32>
    %137 = tpu.concatenate %135, %136 in 0 : vector<15x256xf32>, vector<1x256xf32> -> vector<16x256xf32>
    %138 = vector.broadcast %9 : vector<16x1xf32> to vector<16x256xf32>
    %139 = arith.mulf %137, %138 : vector<16x256xf32>
    %140 = arith.truncf %134 : vector<16x256xf32> to vector<16x256xbf16>
    %141 = arith.truncf %129 : vector<16x256xf32> to vector<16x256xbf16>
    %142 = arith.truncf %139 : vector<16x256xf32> to vector<16x256xbf16>
    %143 = tpu.concatenate %140, %141, %142 in 1 : vector<16x256xbf16>, vector<16x256xbf16>, vector<16x256xbf16> -> vector<16x768xbf16>
    %c0_33 = arith.constant 0 : index
    %c0_34 = arith.constant 0 : index
    %144 = vector.load %arg12[%c0_33, %c0_34] : memref<768x128xbf16, #tpu.memory_space<vmem>>, vector<768x128xbf16>
    %cst_35 = arith.constant dense<0.000000e+00> : vector<16x128xf32>
    %145 = tpu.matmul %143, %144, %cst_35 {dimension_numbers = #tpu.dot_dimension_numbers<[1], [0], [0], [1], [0, 0, 1, 1], [], []>} : vector<16x768xbf16>, vector<768x128xbf16>, vector<16x128xf32> -> vector<16x128xf32>
    %c0_36 = arith.constant 0 : index
    %c0_37 = arith.constant 0 : index
    %146 = vector.load %arg13[%c0_36, %c0_37] : memref<1x128xf32, #tpu.memory_space<vmem>>, vector<1x128xf32>
    %147 = vector.broadcast %146 : vector<1x128xf32> to vector<16x128xf32>
    %148 = arith.addf %145, %147 : vector<16x128xf32>
    %c0_38 = arith.constant 0 : index
    %c0_39 = arith.constant 0 : index
    %149 = vector.load %arg14[%c0_38, %c0_39] : memref<16x128xf32, #tpu.memory_space<vmem>>, vector<16x128xf32>
    tpu.vector_store %arg14[%c0_38, %c0_39], %148 {strides = array<i32>} : memref<16x128xf32, #tpu.memory_space<vmem>>, vector<16x128xf32>,
    return
  }
  func.func @transform_0(%arg0: i32) -> (i32, i32) {
    %c0_i32 = arith.constant 0 : i32
    %c0_i32_0 = arith.constant 0 : i32
    return %arg0, %c0_i32 : i32, i32
  }
  func.func @transform_1(%arg0: i32) -> (i32, i32) {
    %c0_i32 = arith.constant 0 : i32
    %c0_i32_0 = arith.constant 0 : i32
    return %arg0, %c0_i32 : i32, i32
  }
  func.func @transform_2(%arg0: i32) -> (i32, i32) {
    %c0_i32 = arith.constant 0 : i32
    %c0_i32_0 = arith.constant 0 : i32
    %c0_i32_1 = arith.constant 0 : i32
    return %c0_i32, %c0_i32_0 : i32, i32
  }
  func.func @transform_3(%arg0: i32) -> (i32, i32) {
    %c0_i32 = arith.constant 0 : i32
    %c0_i32_0 = arith.constant 0 : i32
    %c0_i32_1 = arith.constant 0 : i32
    return %c0_i32, %c0_i32_0 : i32, i32
  }
  func.func @transform_4(%arg0: i32) -> (i32, i32) {
    %c0_i32 = arith.constant 0 : i32
    %c0_i32_0 = arith.constant 0 : i32
    %c0_i32_1 = arith.constant 0 : i32
    return %c0_i32, %c0_i32_0 : i32, i32
  }
  func.func @transform_5(%arg0: i32) -> (i32, i32) {
    %c0_i32 = arith.constant 0 : i32
    %c0_i32_0 = arith.constant 0 : i32
    %c0_i32_1 = arith.constant 0 : i32
    return %c0_i32, %c0_i32_0 : i32, i32
  }
  func.func @transform_6(%arg0: i32) -> (i32, i32) {
    %c0_i32 = arith.constant 0 : i32
    %c0_i32_0 = arith.constant 0 : i32
    %c0_i32_1 = arith.constant 0 : i32
    return %c0_i32, %c0_i32_0 : i32, i32
  }
  func.func @transform_7(%arg0: i32) -> (i32, i32) {
    %c0_i32 = arith.constant 0 : i32
    %c0_i32_0 = arith.constant 0 : i32
    %c0_i32_1 = arith.constant 0 : i32
    return %c0_i32, %c0_i32_0 : i32, i32
  }
  func.func @transform_8(%arg0: i32) -> (i32, i32) {
    %c0_i32 = arith.constant 0 : i32
    %c0_i32_0 = arith.constant 0 : i32
    %c0_i32_1 = arith.constant 0 : i32
    return %c0_i32, %c0_i32_0 : i32, i32
  }
  func.func @transform_9(%arg0: i32) -> (i32, i32) {
    %c0_i32 = arith.constant 0 : i32
    %c0_i32_0 = arith.constant 0 : i32
    %c0_i32_1 = arith.constant 0 : i32
    return %c0_i32, %c0_i32_0 : i32, i32
  }
  func.func @transform_10(%arg0: i32) -> (i32, i32) {
    %c0_i32 = arith.constant 0 : i32
    %c0_i32_0 = arith.constant 0 : i32
    %c0_i32_1 = arith.constant 0 : i32
    return %c0_i32, %c0_i32_0 : i32, i32
  }
  func.func @transform_11(%arg0: i32) -> (i32, i32) {
    %c0_i32 = arith.constant 0 : i32
    %c0_i32_0 = arith.constant 0 : i32
    %c0_i32_1 = arith.constant 0 : i32
    return %c0_i32, %c0_i32_0 : i32, i32
  }
  func.func @transform_12(%arg0: i32) -> (i32, i32) {
    %c0_i32 = arith.constant 0 : i32
    %c0_i32_0 = arith.constant 0 : i32
    %c0_i32_1 = arith.constant 0 : i32
    return %c0_i32, %c0_i32_0 : i32, i32
  }
  func.func @transform_13(%arg0: i32) -> (i32, i32) {
    %c0_i32 = arith.constant 0 : i32
    %c0_i32_0 = arith.constant 0 : i32
    return %arg0, %c0_i32 : i32, i32
  }
}

</mosaic_0001>

<bundles_post_ra>
// kernel: tpu_custom_call.1
= control target key start
LH: loop header
LB: loop body
LE: loop exit
PB: predicated region body
PF: predicated region fallthrough
CT: control target
= control target key end

     0   :  { %6 = vsyncpa [#allocation3], 0  ;;  %s145_s0 = inlined_call_operand.hbm [shape: f32[32,128], index: 0, kind: input, shape index: {}]   ;;  %s146_s1 = inlined_call_operand.hbm [shape: f32[32,128], index: 1, kind: output, shape index: {}]  }
   0x1   :  { %7 = vsyncpa [#allocation4], 0  ;;  %s12_s8 = sshll.u32 %s145_s0, 4  ;;  %s119_s9 = smov [#allocation2]   ;;  %s13_s8 = int_to_ptr.hbm [resolvable:$true] %s12_s8 }
   0x2   :  { %s14_s10 = sshll.u32 %s119_s9, 4  ;;  %s120_s11 = smov 128   ;;  %s15_s10 = int_to_ptr.vmem [resolvable:$true] %s14_s10 }
   0x3   :  { %s121_s12 = smov 8  }
   0x4   :  { %20 = dma.hbm_to_vmem [thread:$0]  %s13_s8, 512, %s15_s10, [#allocation3], %s120_s11, %s120_s11, %s121_s12  }
   0x5   :  { %115 = dma.done.wait [#allocation3], 512  }
   0x6   :  { %116 = vsyncadd [#allocation3], 4294966784  ;;  %v33_v0 = vlaneseq  ;;  %v25_v2 = vld [vmem:[#allocation2] sm:$0xff]  ;;  %v28_v3 = vld [vmem:[#allocation2 + $0x18] sm:$0xff]  ;;  %s122_s0 = smov [#allocation5]   ;;  %s50_s16 = sshll.u32 %s146_s1, 4  ;;  %s51_s16 = int_to_ptr.hbm [resolvable:$true] %s50_s16 }
   0x7   :  { %v26_v4 = vld [vmem:[#allocation2 + $0x8] sm:$0xff]  ;;  %v29_v5 = vrot.slane %v25_v2, 7  ;;  %v32_v6 = vrot.slane %v28_v3, 7  ;;  %v27_v8 = vld [vmem:[#allocation2 + $0x10] sm:$0xff]  ;;  %s48_s13 = sshll.u32 %s122_s0, 4  ;;  %s49_s13 = int_to_ptr.vmem [resolvable:$true] %s48_s13 }
   0x8   :  { %v34_v1 = vshrl.u32 %v33_v0, 7  ;;  %v30_v7 = vrot.slane %v26_v4, 7  ;;  %v31_v9 = vrot.slane %v27_v8, 7 }
   0xa   :  { %vm35_vm0 = vcmp.lt.s32.totalorder %v34_v1, 1 }
   0xb   :  { %v39_v10 = vsel %vm35_vm0, %v32_v6, %v29_v5  ;;  %v38_v11 = vsel %vm35_vm0, %v29_v5, %v30_v7  ;;  %v37_v12 = vsel %vm35_vm0, %v30_v7, %v31_v9  ;;  %v36_v13 = vsel %vm35_vm0, %v31_v9, %v32_v6 }
   0xc   :  { %40 = vst [vmem:[#allocation5] sm:$0xff] %v39_v10 }
   0xd   :  { %41 = vst [vmem:[#allocation5 + $0x8] sm:$0xff] %v38_v11 }
   0xe   :  { %42 = vst [vmem:[#allocation5 + $0x10] sm:$0xff] %v37_v12 }
   0xf   :  { %43 = vst [vmem:[#allocation5 + $0x18] sm:$0xff] %v36_v13 }
  0x10   :  { %56 = dma.vmem_to_hbm [thread:$0]  %s49_s13, 512, %s51_s16, [#allocation4], %s120_s11, %s120_s11, %s121_s12  }
  0x11   :  { %117 = dma.done.wait [#allocation4], 512  }
  0x12   :  { %118 = vsyncadd [#allocation4], 4294966784 }
  0x13   :  { %61 = vsyncpa [#allocation3], 1 }
  0x14   :  { %62 = vsyncpa [#allocation4], 1 }

// kernel: tpu_custom_call.1
= control target key start
LH: loop header
LB: loop body
LE: loop exit
PB: predicated region body
PF: predicated region fallthrough
CT: control target
= control target key end

     0   :  { %6 = vsyncpa [#allocation3], 0  ;;  %s145_s0 = inlined_call_operand.hbm [shape: f32[32,128], index: 0, kind: input, shape index: {}]   ;;  %s146_s1 = inlined_call_operand.hbm [shape: f32[32,128], index: 1, kind: output, shape index: {}]  }
   0x1   :  { %7 = vsyncpa [#allocation4], 0  ;;  %s12_s8 = sshll.u32 %s145_s0, 4  ;;  %s119_s9 = smov [#allocation2]   ;;  %s13_s8 = int_to_ptr.hbm [resolvable:$true] %s12_s8 }
   0x2   :  { %s14_s10 = sshll.u32 %s119_s9, 4  ;;  %s120_s11 = smov 128   ;;  %s15_s10 = int_to_ptr.vmem [resolvable:$true] %s14_s10 }
   0x3   :  { %s121_s12 = smov 8  }
   0x4   :  { %20 = dma.hbm_to_vmem [thread:$0]  %s13_s8, 512, %s15_s10, [#allocation3], %s120_s11, %s120_s11, %s121_s12  }
   0x5   :  { %115 = dma.done.wait [#allocation3], 512  }
   0x6   :  { %116 = vsyncadd [#allocation3], 4294966784  ;;  %v33_v0 = vlaneseq  ;;  %v25_v2 = vld [vmem:[#allocation2] sm:$0xff]  ;;  %v28_v3 = vld [vmem:[#allocation2 + $0x18] sm:$0xff]  ;;  %s122_s0 = smov [#allocation5]   ;;  %s50_s16 = sshll.u32 %s146_s1, 4  ;;  %s51_s16 = int_to_ptr.hbm [resolvable:$true] %s50_s16 }
   0x7   :  { %v26_v4 = vld [vmem:[#allocation2 + $0x8] sm:$0xff]  ;;  %v29_v5 = vrot.slane %v25_v2, 7  ;;  %v32_v6 = vrot.slane %v28_v3, 7  ;;  %v27_v8 = vld [vmem:[#allocation2 + $0x10] sm:$0xff]  ;;  %s48_s13 = sshll.u32 %s122_s0, 4  ;;  %s49_s13 = int_to_ptr.vmem [resolvable:$true] %s48_s13 }
   0x8   :  { %v34_v1 = vshrl.u32 %v33_v0, 7  ;;  %v30_v7 = vrot.slane %v26_v4, 7  ;;  %v31_v9 = vrot.slane %v27_v8, 7 }
   0xa   :  { %vm35_vm0 = vcmp.lt.s32.totalorder %v34_v1, 1 }
   0xb   :  { %v39_v10 = vsel %vm35_vm0, %v32_v6, %v29_v5  ;;  %v38_v11 = vsel %vm35_vm0, %v29_v5, %v30_v7  ;;  %v37_v12 = vsel %vm35_vm0, %v30_v7, %v31_v9  ;;  %v36_v13 = vsel %vm35_vm0, %v31_v9, %v32_v6 }
   0xc   :  { %40 = vst [vmem:[#allocation5] sm:$0xff] %v39_v10 }
   0xd   :  { %41 = vst [vmem:[#allocation5 + $0x8] sm:$0xff] %v38_v11 }
   0xe   :  { %42 = vst [vmem:[#allocation5 + $0x10] sm:$0xff] %v37_v12 }
   0xf   :  { %43 = vst [vmem:[#allocation5 + $0x18] sm:$0xff] %v36_v13 }
  0x10   :  { %56 = dma.vmem_to_hbm [thread:$0]  %s49_s13, 512, %s51_s16, [#allocation4], %s120_s11, %s120_s11, %s121_s12  }
  0x11   :  { %117 = dma.done.wait [#allocation4], 512  }
  0x12   :  { %118 = vsyncadd [#allocation4], 4294966784 }
  0x13   :  { %61 = vsyncpa [#allocation3], 1 }
  0x14   :  { %62 = vsyncpa [#allocation4], 1 }

// kernel: tpu_custom_call.1
= control target key start
LH: loop header
LB: loop body
LE: loop exit
PB: predicated region body
PF: predicated region fallthrough
CT: control target
= control target key end

     0   :  { %s5804_s0 = inlined_call_operand.hbm [shape: bf16[32,128], index: 0, kind: input, shape index: {}]   ;;  %s5805_s1 = inlined_call_operand.hbm [shape: bf16[32,128], index: 1, kind: input, shape index: {}]   ;;  %s5806_s2 = inlined_call_operand.hbm [shape: bf16[384,256], index: 2, kind: input, shape index: {}]   ;;  %s5807_s3 = inlined_call_operand.vmem [shape: f32[1,256], index: 3, kind: input, shape index: {}]   ;;  %s5808_s4 = inlined_call_operand.hbm [shape: bf16[768,128], index: 4, kind: input, shape index: {}]   ;;  %s5809_s5 = inlined_call_operand.hbm [shape: f32[1,128], index: 5, kind: input, shape index: {}]   ;;  %s5810_s6 = inlined_call_operand.hbm [shape: bf16[384,128], index: 6, kind: input, shape index: {}]   ;;  %s5811_s7 = inlined_call_operand.vmem [shape: f32[1,128], index: 7, kind: input, shape index: {}]   ;;  %s5812_s8 = inlined_call_operand.hbm [shape: bf16[384,256], index: 8, kind: input, shape index: {}]   ;;  %s5813_s9 = inlined_call_operand.hbm [shape: bf16[128,768], index: 9, kind: input, shape index: {}]   ;;  %s5814_s10 = inlined_call_operand.vmem [shape: f32[1,256], index: 10, kind: input, shape index: {}]   ;;  %s5815_s11 = inlined_call_operand.hbm [shape: bf16[768,128], index: 11, kind: input, shape index: {}]   ;;  %s5816_s12 = inlined_call_operand.vmem [shape: f32[1,128], index: 12, kind: input, shape index: {}]   ;;  %s5817_s13 = inlined_call_operand.hbm [shape: f32[32,128], index: 13, kind: output, shape index: {}]  }
   0x1   :  { %5824 = sst [smem:[#allocation25_spill]] %s5804_s0 }
   0x2   :  { %5825 = sst [smem:[#allocation26_spill]] %s5806_s2 }
   0x3   :  { %5826 = sst [smem:[#allocation27_spill]] %s5808_s4 }
   0x4   :  { %5827 = sst [smem:[#allocation28_spill]] %s5809_s5 }
   0x5   :  { %5828 = sst [smem:[#allocation29_spill]] %s5810_s6 }
   0x6   :  { %5829 = sst [smem:[#allocation30_spill]] %s5812_s8 }
   0x7   :  { %5830 = sst [smem:[#allocation31_spill]] %s5813_s9 }
   0x8   :  { %5831 = sst [smem:[#allocation32_spill]] %s5814_s10 }
   0x9   :  { %5832 = sst [smem:[#allocation33_spill]] %s5815_s11 }
   0xa   :  { %5833 = sst [smem:[#allocation34_spill]] %s5816_s12 }
   0xb   :  { %5834 = sst [smem:[#allocation35_spill]] %s5817_s13 }
   0xc   :  { %18 = vsyncpa [#allocation3], 0 }
   0xd   :  { %20 = vsyncpa [#allocation3 + $0x1], 0 }
   0xe   :  { %21 = vsyncpa [#allocation6], 0 }
   0xf   :  { %23 = vsyncpa [#allocation6 + $0x1], 0 }
  0x10   :  { %24 = vsyncpa [#allocation9], 0 }
  0x11   :  { %25 = vsyncpa [#allocation12], 0 }
  0x12   :  { %26 = vsyncpa [#allocation15], 0 }
  0x13   :  { %27 = vsyncpa [#allocation4], 0 }
  0x14   :  { %29 = vsyncpa [#allocation4 + $0x1], 0  ;;  %s5400_s25 = smov 0   ;;  %s5402_s26 = smov 0  }
  0x15   :  { %s5404_s27 = smov 0   ;;  %s5406_s28 = smov 0  }
  0x16 LB: > { %s5835_s2 = sld [smem:[#allocation26_spill]]  ;;  %s5424_s15 = sadd.s32 4294967295, %s5312_s28   ;;  %s5312_s28 = sphi %s5406_s28, %s5860_s28   ;;  %s5308_s27 = sphi %s5404_s27, %s5859_s27   ;;  %s5304_s26 = sphi %s5402_s26, %s5858_s26   ;;  %s5300_s25 = sphi %s5400_s25, %s5857_s25  }
  0x17   : > { %p3454_p0 = scmp.ge.s32.totalorder %s5312_s28, 1  ;;  %p56_p1 = scmp.eq.s32.totalorder %s5424_s15, 0 }
  0x18   : > { %p349_p2 = scmp.lt.s32.totalorder %s5312_s28, 3  ;;  %s5314_s17 = smov [#allocation7]  }
  0x19   : > { %s362_s18 = sshll.u32 %s5314_s17, 4  ;;  %s5837_s4 = sld [smem:[#allocation27_spill]]  ;;  %s363_s18 = int_to_ptr.vmem [resolvable:$true] %s362_s18 }
  0x1a   : > { %p5429_p3 = pnand %p3454_p0, %p349_p2  ;;  %s5315_s23 = smov [#allocation8]  }
  0x1b   : > { %s379_s24 = sshll.u32 %s5315_s23, 4  ;;  %s5819_s29 = smov 128   ;;  %s380_s24 = int_to_ptr.vmem [resolvable:$true] %s379_s24 }
  0x1c   : > { %s360_s14 = sshll.u32 %s5835_s2, 4  ;;  %p4856_p4 = pneg %p5429_p3  ;;  %s361_s14 = int_to_ptr.hbm [resolvable:$true] %s360_s14 }
  0x1d   : > { %s5317_s30 = smov 8   ;;  %s5820_s17 = smov 64  }
  0x1e   : > { %p5441_p6 = pnand %p4856_p4, %p56_p1  ;;  %s5822_s19 = smov 4  }
  0x1f   : > { %s377_s21 = sshll.u32 %s5837_s4, 4  ;;  %s5839_s6 = sld [smem:[#allocation29_spill]]  ;;  %s378_s21 = int_to_ptr.hbm [resolvable:$true] %s377_s21 }
  0x20   : > { %4859 = dma.hbm_to_vmem [thread:$0]  (!%p5441_p6), %s361_s14, 6144, %s363_s18, [#allocation6], %s5819_s29, %s5819_s29, %s5317_s30  }
  0x21   : > { %4862 = dma.hbm_to_vmem [thread:$0]  (!%p5441_p6), %s378_s21, 6144, %s380_s24, [#allocation9], %s5820_s17, %s5820_s17, %s5822_s19  }
  0x22   : > { %s5320_s4 = smov [#allocation11]   ;;  %s5840_s9 = sld [smem:[#allocation31_spill]] }
  0x23   : > { %s405_s13 = sshll.u32 %s5320_s4, 4  ;;  %s5321_s18 = smov [#allocation14]   ;;  %s406_s13 = int_to_ptr.vmem [resolvable:$true] %s405_s13 }
  0x24   : > { %s436_s21 = sshll.u32 %s5321_s18, 4  ;;  %s5322_s2 = smov 384   ;;  %s437_s21 = int_to_ptr.vmem [resolvable:$true] %s436_s21 }
  0x25   : > { %s403_s23 = sshll.u32 %s5839_s6, 4  ;;  %s5323_s24 = smov 24   ;;  %s404_s23 = int_to_ptr.hbm [resolvable:$true] %s403_s23 }
  0x26   : > { %4868 = dma.hbm_to_vmem [thread:$0]  (!%p5441_p6), %s404_s23, 3072, %s406_s13, [#allocation12], %s5820_s17, %s5820_s17, %s5822_s19  }
  0x27   : > { %s5841_s5 = sld [smem:[#allocation28_spill]]  ;;  %s5324_s12 = smov [#allocation10]  }
  0x28   : > { %s434_s14 = sshll.u32 %s5840_s9, 4  ;;  %s394_s29 = sshll.u32 %s5324_s12, 4  ;;  %s435_s14 = int_to_ptr.hbm [resolvable:$true] %s434_s14  ;;  %s395_s29 = int_to_ptr.vmem [resolvable:$true] %s394_s29 }
  0x29   : > { %4874 = dma.hbm_to_vmem [thread:$0]  (!%p5441_p6), %s435_s14, 6144, %s437_s21, [#allocation15], %s5322_s2, %s5322_s2, %s5323_s24  }
  0x2a   : > { %s5842_s8 = sld [smem:[#allocation30_spill]]  ;;  %s5325_s14 = smov [#allocation13]  }
  0x2b   : > { %s422_s21 = sshll.u32 %s5325_s14, 4  ;;  %s5843_s11 = sld [smem:[#allocation33_spill]]  ;;  %s423_s21 = int_to_ptr.vmem [resolvable:$true] %s422_s21 }
  0x2c   : > { %s5844_s20 = smov 128   ;;  %s3453_s12 = sadd.s32 4294967294, %s5312_s28  }
  0x2d   : > { %s392_s10 = sshll.u32 %s5841_s5, 4  ;;  %s5491_s13 = sadd.s32 1, %s5312_s28   ;;  %s393_s10 = int_to_ptr.hbm [resolvable:$true] %s392_s10 }
  0x2e   : > { %4865 = dma.hbm_to_vmem [thread:$0]  (!%p5441_p6), %s393_s10, 16, %s395_s29, [#allocation9]  }
  0x2f   : > { %s5326_s29 = smov [#allocation16]   ;;  %s42_s23 = sadd.s32 1, %s5308_s27 }
  0x30   : > { %s420_s18 = sshll.u32 %s5842_s8, 4  ;;  %s453_s10 = sshll.u32 %s5326_s29, 4  ;;  %s421_s18 = int_to_ptr.hbm [resolvable:$true] %s420_s18  ;;  %s454_s10 = int_to_ptr.vmem [resolvable:$true] %s453_s10 }
  0x31   : > { %s451_s4 = sshll.u32 %s5843_s11, 4  ;;  %s39_s14 = ssub.s32 %s5312_s28, %s5491_s13  ;;  %s452_s4 = int_to_ptr.hbm [resolvable:$true] %s451_s4 }
  0x32   : > { %4871 = dma.hbm_to_vmem [thread:$0]  (!%p5441_p6), %s421_s18, 6144, %s423_s21, [#allocation12], %s5844_s20, %s5844_s20, %s5317_s30  }
  0x33   : > { %4877 = dma.hbm_to_vmem [thread:$0]  (!%p5441_p6), %s452_s4, 6144, %s454_s10, [#allocation15], %s5820_s17, %s5820_s17, %s5822_s19  }
  0x34   : > { %p49_p7 = scmp.ne.s32.totalorder %s5308_s27, %s5304_s26  ;;  %p40_p8 = scmp.eq.s32.totalorder %s39_s14, 0 }
  0x35   : > { %p50_p9 = scmp.eq.s32.totalorder %s5312_s28, 0  ;;  %p55_p10 = scmp.ne.s32.totalorder %s5304_s26, %s5300_s25 }
  0x36   : > { %p336_p11 = scmp.eq.s32.totalorder %s5424_s15, 1  ;;  %p342_p2 = scmp.eq.s32.totalorder %s3453_s12, 1 }
  0x37   : > { %s5503_s30 = scalar_select %p40_p8, %s5308_s27, %s42_s23  }
  0x38   : > { %p5505_p12 = por %p50_p9, %p49_p7  ;;  %p5511_p13 = por %p56_p1, %p55_p10 }
  0x39   : > { %p5515_p0 = por %p336_p11, %p49_p7  ;;  %p4896_p4 = scmp.lt.s32.totalorder %s5312_s28, 2 }
  0x3a   : > { %s470_s2 = sand.u32 1, %s5308_s27   ;;  %p5521_p6 = por %p342_p2, %p55_p10 }
  0x3b   : > { %s3463_s4 = sshll.u32 %s470_s2, 3  ;;  %s4553_s20 = sshll.u32 %s5312_s28, 3 }
  0x3c   : > { %s5849_s0 = sld [smem:[#allocation25_spill]]  ;;  %s474_s17 = scalar_lea.vmem [#allocation2], %s3463_s4 }
  0x3d   : > { %s482_s19 = sshll.u32 %s474_s17, 4  ;;  %p5531_p7 = pnand %p4896_p4, %p5505_p12  ;;  %s483_s19 = int_to_ptr.vmem [resolvable:$true] %s482_s19 }
  0x3e   : > { %s501_s8 = scalar_lea.hbm %s5805_s1, %s4553_s20  ;;  %s496_s9 = scalar_lea.vmem [#allocation5], %s3463_s4 }
  0x3f   : > { %s5538_s11 = sshll.u32 %s496_s9, 4  ;;  %s502_s29 = sshll.u32 %s501_s8, 4  ;;  %s503_s29 = int_to_ptr.hbm [resolvable:$true] %s502_s29  ;;  %s505_s11 = int_to_ptr.vmem [resolvable:$true] %s5538_s11 }
  0x40   : > { %s471_s10 = scalar_lea.sflag [#allocation3], %s470_s2  ;;  %p5170_p9 = pneg %p5531_p7 }
  0x42   : > { %s479_s23 = scalar_lea.hbm %s5849_s0, %s4553_s20  ;;  %s5173_s6 = scalar_lea.hbm %s5849_s0, 16 }
  0x43   : > { %s480_s14 = sshll.u32 %s479_s23, 4  ;;  %s481_s14 = int_to_ptr.hbm [resolvable:$true] %s480_s14 }
  0x44   : > { %s5166_s23 = sshra.s32 %s481_s14, 4  ;;  %s5167_s23 = int_to_ptr.hbm [resolvable:$true] %s5166_s23 }
  0x45   : > { %s5168_s17 = scalar_lea.hbm %s5167_s23, 8  ;;  %p5174_p12 = scmp.lt.s32.totalorder %s5167_s23, %s5849_s0 }
  0x46   : > { %p5169_p8 = scmp.ne.s32.totalorder %s5167_s23, %s5168_s17  ;;  %p5175_p2 = scmp.lt.s32.totalorder %s5173_s6, %s5168_s17 }
  0x48   : > { %p5171_p10 = pnand %p5170_p9, %p5169_p8  ;;  %p5176_p4 = por %p5175_p2, %p5174_p12 }
  0x4a   : > { %p5172_p11 = pneg %p5171_p10 }
  0x4c   : > { %p5177_p5 = pnand %p5176_p4, %p5172_p11 }
  0x4e   : > { %5180 = shalt.err (!%p5177_p5)
}
  0x4f   : > { %s5851_s8 = smov 4   ;;  %s5852_s9 = smov 64  }
  0x50   : > { %4881 = dma.hbm_to_vmem [thread:$0]  (!%p5531_p7), %s481_s14, 128, %s483_s19, %s471_s10, %s5852_s9, %s5852_s9, %s5851_s8  }
  0x51   : > { %s492_s2 = sand.u32 1, %s5312_s28   ;;  %s5196_s5 = sshra.s32 %s503_s29, 4  ;;  %s5197_s5 = int_to_ptr.hbm [resolvable:$true] %s5196_s5 }
  0x52   : > { %s493_s22 = scalar_lea.sflag [#allocation6], %s492_s2  ;;  %s5198_s23 = scalar_lea.hbm %s5197_s5, 8 }
  0x53   : > { %p5199_p8 = scmp.ne.s32.totalorder %s5197_s5, %s5198_s23  ;;  %s5203_s20 = scalar_lea.hbm %s5805_s1, 16 }
  0x54   : > { %p5204_p11 = scmp.lt.s32.totalorder %s5197_s5, %s5805_s1  ;;  %p5205_p12 = scmp.lt.s32.totalorder %s5203_s20, %s5198_s23 }
  0x55   : > { %p5201_p5 = pnand %p5199_p8, %p5170_p9 }
  0x56   : > { %p5206_p2 = por %p5205_p12, %p5204_p11 }
  0x57   : > { %p5202_p10 = pneg %p5201_p5 }
  0x59   : > { %p5207_p4 = pnand %p5206_p2, %p5202_p10 }
  0x5b   : > { %5210 = shalt.err (!%p5207_p4)
}
  0x5c   : > { %4884 = dma.hbm_to_vmem [thread:$0]  (!%p5531_p7), %s503_s29, 128, %s505_s11, %s493_s22, %s5852_s9, %s5852_s9, %s5851_s8  }
  0x5d   : > { %516 = sbr.rel (%p5429_p3) target bundleno = 852 (0x354), region = 72  ;;  %s5575_s19 = sand.u32 (!%p5429_p3), 1, %s5304_s26  }
  0x5e   : > { %s3470_s0 = sshll.u32 (!%p5429_p3), %s5575_s19, 3  ;;  %s519_s14 = scalar_lea.sflag (!%p5429_p3), [#allocation3], %s5575_s19 }
  0x5f   : > { %s5579_s10 = scalar_lea.vmem (!%p5429_p3), [#allocation2], %s3470_s0 }
  0x62   : > { %5271 = dma.done.wait (%p5511_p13), %s519_s14, 128  }
  0x63   : > { %5273 = vsyncadd (%p5511_p13), %s519_s14, 4294967168  ;;  %s528_s11 = sand.u32 1, %s5424_s15   ;;  %s5586_s12 = scalar_lea.vmem [#allocation5], %s3470_s0 }
  0x64   : > { %s529_s16 = scalar_lea.sflag [#allocation6], %s528_s11 }
  0x65   : > { %5275 = dma.done.wait (%p5511_p13), %s529_s16, 128  }
  0x66   : > { %5277 = vsyncadd (%p5511_p13), %s529_s16, 4294967168 }
  0x67   : > { %5279 = dma.done.wait (%p56_p1), [#allocation6], 6144  }
  0x68   : > { %5281 = vsyncadd (%p56_p1), [#allocation6], 4294961152 }
  0x69   : > { %5283 = dma.done.wait (%p56_p1), [#allocation9], 6160  }
  0x6a   : > { %5285 = vsyncadd (%p56_p1), [#allocation9], 4294961136 }
  0x6b   : > { %5287 = dma.done.wait (%p56_p1), [#allocation12], 9216  }
  0x6c   : > { %5289 = vsyncadd (%p56_p1), [#allocation12], 4294958080 }
  0x6d   : > { %5291 = dma.done.wait (%p56_p1), [#allocation15], 12288  }
  0x6e   : > { %5293 = vsyncadd (%p56_p1), [#allocation15], 4294955008  ;;  %v3546_v0 = vld [vmem:[#allocation7 + $0x70] sm:$0xf]  ;;  %v4572_v1 = vld [vmem:[#allocation7 + $0x74] sm:$0xf0]  ;;  %v619_v24 = vlaneseq }
  0x6f   : > { %v3610_v2 = vld [vmem:[#allocation7 + $0xf0] sm:$0xf]  ;;  %v3547_v3 = vor.u32 %v4572_v1, %v3546_v0  ;;  %v4588_v4 = vld [vmem:[#allocation7 + $0xf4] sm:$0xf0]  ;;  %v3538_v9 = vld [vmem:[#allocation7 + $0x60] sm:$0xf] }
  0x70   : > { %v3674_v5 = vld [vmem:[#allocation7 + $0x170] sm:$0xf]  ;;  %v4604_v6 = vld [vmem:[#allocation7 + $0x174] sm:$0xf0]  ;;  %v3611_v7 = vor.u32 %v4588_v4, %v3610_v2  ;;  %v4570_v10 = vld [vmem:[#allocation7 + $0x64] sm:$0xf0] }
  0x71   : > { %v3675_v8 = vor.u32 %v4604_v6, %v3674_v5  ;;  %v3602_v11 = vld [vmem:[#allocation7 + $0xe0] sm:$0xf]  ;;  %990 = vmatpush.bf16.msra.mxu0 %v3547_v3  ;;  %v3539_v12 = vor.u32 %v4570_v10, %v3538_v9  ;;  %v4586_v13 = vld [vmem:[#allocation7 + $0xe4] sm:$0xf0]  ;;  %v3530_v18 = vld [vmem:[#allocation7 + $0x50] sm:$0xf] }
  0x72   : > { %v3666_v14 = vld [vmem:[#allocation7 + $0x160] sm:$0xf]  ;;  %v4602_v15 = vld [vmem:[#allocation7 + $0x164] sm:$0xf0]  ;;  %1004 = vmatpush.bf16.msra.mxu1 %v3611_v7  ;;  %v3603_v16 = vor.u32 %v4586_v13, %v3602_v11  ;;  %v4568_v19 = vld [vmem:[#allocation7 + $0x54] sm:$0xf0] }
  0x73   : > { %1018 = vmatpush.bf16.msra.mxu2 %v3675_v8  ;;  %v3667_v17 = vor.u32 %v4602_v15, %v3666_v14  ;;  %v3594_v20 = vld [vmem:[#allocation7 + $0xd0] sm:$0xf]  ;;  %v4584_v21 = vld [vmem:[#allocation7 + $0xd4] sm:$0xf0]  ;;  %v3531_v25 = vor.u32 %v4568_v19, %v3530_v18  ;;  %v3522_v26 = vld [vmem:[#allocation7 + $0x40] sm:$0xf] }
  0x74   : > { %v3658_v22 = vld [vmem:[#allocation7 + $0x150] sm:$0xf]  ;;  %v4600_v23 = vld [vmem:[#allocation7 + $0x154] sm:$0xf0]  ;;  %v4566_v27 = vld [vmem:[#allocation7 + $0x44] sm:$0xf0]  ;;  %v3595_v28 = vor.u32 %v4584_v21, %v3594_v20 }
  0x75   : > { %991 = vmatpush.bf16.msra.mxu0 %v3539_v12  ;;  %v3659_v29 = vor.u32 %v4600_v23, %v3658_v22  ;;  %v3586_v30 = vld [vmem:[#allocation7 + $0xc0] sm:$0xf]  ;;  %v4571_v31 = vld [vmem:[#allocation7 + $0x74] sm:$0xf]  ;;  %v3548_v32 = vld [vmem:[#allocation7 + $0x78] sm:$0xf0]  ;;  %v3523_v39 = vor.u32 %v4566_v27, %v3522_v26 }
  0x76   : > { %1005 = vmatpush.bf16.msra.mxu1 %v3603_v16  ;;  %v4582_v33 = vld [vmem:[#allocation7 + $0xc4] sm:$0xf0]  ;;  %v3650_v34 = vld [vmem:[#allocation7 + $0x140] sm:$0xf]  ;;  %v3551_v36 = vor.u32 %v4571_v31, %v3548_v32  ;;  %v4569_v37 = vld [vmem:[#allocation7 + $0x64] sm:$0xf] }
  0x77   : > { %1019 = vmatpush.bf16.msra.mxu2 %v3667_v17  ;;  %v4598_v35 = vld [vmem:[#allocation7 + $0x144] sm:$0xf0]  ;;  %v5608_v38 = vshrl.u32 %v619_v24, 7  ;;  %v3514_v40 = vld [vmem:[#allocation7 + $0x30] sm:$0xf]  ;;  %v3587_v43 = vor.u32 %v4582_v33, %v3586_v30  ;;  %vm665_vm0 = vcmask 1046528  }
  0x78   : > { %1032 = vmatpush.bf16.msra.mxu3 %v3551_v36  ;;  %v4564_v41 = vld [vmem:[#allocation7 + $0x34] sm:$0xf0]  ;;  %v3540_v42 = vld [vmem:[#allocation7 + $0x68] sm:$0xf0]  ;;  %v3651_v44 = vor.u32 %v4598_v35, %v3650_v34  ;;  %v3578_v45 = vld [vmem:[#allocation7 + $0xb0] sm:$0xf] }
  0x79   : > { %992 = vmatpush.bf16.msra.mxu0 %v3531_v25  ;;  %v4580_v46 = vld [vmem:[#allocation7 + $0xb4] sm:$0xf0]  ;;  %v3642_v47 = vld [vmem:[#allocation7 + $0x130] sm:$0xf]  ;;  %v3543_v48 = vor.u32 %v4569_v37, %v3540_v42  ;;  %v4567_v50 = vld [vmem:[#allocation7 + $0x54] sm:$0xf]  ;;  %v3515_v52 = vor.u32 %v4564_v41, %v3514_v40 }
  0x7a   : > { %1006 = vmatpush.bf16.msra.mxu1 %v3595_v28  ;;  %v4596_v49 = vld [vmem:[#allocation7 + $0x134] sm:$0xf0]  ;;  %v3532_v51 = vld [vmem:[#allocation7 + $0x58] sm:$0xf0]  ;;  %v3506_v53 = vld [vmem:[#allocation7 + $0x20] sm:$0xf]  ;;  %v3579_v57 = vor.u32 %v4580_v46, %v3578_v45 }
  0x7b   : > { %1020 = vmatpush.bf16.msra.mxu2 %v3659_v29  ;;  %v4562_v54 = vld [vmem:[#allocation7 + $0x24] sm:$0xf0]  ;;  %v3535_v55 = vor.u32 %v4567_v50, %v3532_v51  ;;  %v5611_v56 = vadd.s32 8, %v5608_v38  ;;  %v3643_v58 = vor.u32 %v4596_v49, %v3642_v47  ;;  %v3570_v59 = vld [vmem:[#allocation7 + $0xa0] sm:$0xf]  ;;  %vm622_vm1 = vcmp.ne.s32.totalorder %v5608_v38, 0 }
  0x7c   : > { %1033 = vmatpush.bf16.msra.mxu3 %v3543_v48  ;;  %v4565_v60 = vld [vmem:[#allocation7 + $0x44] sm:$0xf]  ;;  %v3524_v61 = vld [vmem:[#allocation7 + $0x48] sm:$0xf0]  ;;  %v4578_v62 = vld [vmem:[#allocation7 + $0xa4] sm:$0xf0]  ;;  %v3507_v1 = vor.u32 %v4562_v54, %v3506_v53 }
  0x7d   : > { %993 = vmatpush.bf16.msra.mxu0 %v3523_v39  ;;  %v3634_v63 = vld [vmem:[#allocation7 + $0x120] sm:$0xf]  ;;  %v4594_v0 = vld [vmem:[#allocation7 + $0x124] sm:$0xf0]  ;;  %v3498_v2 = vld [vmem:[#allocation7 + $0x10] sm:$0xf]  ;;  %v3527_v5 = vor.u32 %v4565_v60, %v3524_v61  ;;  %v3571_v6 = vor.u32 %v4578_v62, %v3570_v59 }
  0x7e   : > { %1007 = vmatpush.bf16.msra.mxu1 %v3587_v43  ;;  %v4560_v3 = vld [vmem:[#allocation7 + $0x14] sm:$0xf0]  ;;  %v3562_v4 = vld [vmem:[#allocation7 + $0x90] sm:$0xf]  ;;  %v3635_v7 = vor.u32 %v4594_v0, %v3634_v63  ;;  %v4563_v8 = vld [vmem:[#allocation7 + $0x34] sm:$0xf] }
  0x7f   : > { %1021 = vmatpush.bf16.msra.mxu2 %v3651_v44  ;;  %v3516_v9 = vld [vmem:[#allocation7 + $0x38] sm:$0xf0]  ;;  %vm629_vm2 = vcmp.ne.s32.totalorder %v5611_v56, 15  ;;  %v646_v10 = vld [vmem:[%s5579_s10] sm:$0xff]   ;;  %v4576_v11 = vld [vmem:[#allocation7 + $0x94] sm:$0xf0]  ;;  %v3499_v16 = vor.u32 %v4560_v3, %v3498_v2 }
  0x80   : > { %1034 = vmatpush.bf16.msra.mxu3 %v3535_v55  ;;  %v3626_v12 = vld [vmem:[#allocation7 + $0x110] sm:$0xf]  ;;  %v4592_v13 = vld [vmem:[#allocation7 + $0x114] sm:$0xf0]  ;;  %v648_v14 = vunpack.c.l.bf16 %v646_v10  ;;  %v649_v15 = vunpack.c.h.bf16 %v646_v10  ;;  %v3490_v17 = vld [vmem:[#allocation7] sm:$0xf]  ;;  %v3519_v23 = vor.u32 %v4563_v8, %v3516_v9  ;;  %v3563_v27 = vor.u32 %v4576_v11, %v3562_v4 }
  0x81   : > { %994 = vmatpush.bf16.msra.mxu0 %v3515_v52  ;;  %v4558_v18 = vld [vmem:[#allocation7 + $0x4] sm:$0xf0]  ;;  %v5327_v19 = vmov 0.0   ;;  %vm656_vm3 = vcmask 1040384   ;;  %v3554_v21 = vld [vmem:[#allocation7 + $0x80] sm:$0xf]  ;;  %v3627_v28 = vor.u32 %v4592_v13, %v3626_v12 }
  0x82   : > { %1008 = vmatpush.bf16.msra.mxu1 %v3579_v57  ;;  %v5619_v20 = vsel %vm622_vm1, 1.0, %v5327_v19  ;;  %v4574_v22 = vld [vmem:[#allocation7 + $0x84] sm:$0xf0]  ;;  %v5624_v24 = vsel %vm629_vm2, 1.0, %v5327_v19  ;;  %v666_v25 = vrot.slane %v648_v14, 1  ;;  %v667_v26 = vrot.slane %v649_v15, 1 }
  0x83   : > { %1022 = vmatpush.bf16.msra.mxu2 %v3643_v58  ;;  %v4561_v29 = vld [vmem:[#allocation7 + $0x24] sm:$0xf]  ;;  %v3508_v30 = vld [vmem:[#allocation7 + $0x28] sm:$0xf0]  ;;  %v657_v31 = vrot.slane %v648_v14, 7  ;;  %v658_v32 = vrot.slane %v649_v15, 7  ;;  %v3491_v33 = vor.u32 %v4558_v18, %v3490_v17  ;;  %v3555_v50 = vor.u32 %v4574_v22, %v3554_v21 }
  0x84   : > { %1035 = vmatpush.bf16.msra.mxu3 %v3527_v5  ;;  %v3618_v34 = vld [vmem:[#allocation7 + $0x100] sm:$0xf]  ;;  %v4590_v35 = vld [vmem:[#allocation7 + $0x104] sm:$0xf0]  ;;  %v4587_v36 = vld [vmem:[#allocation7 + $0xf4] sm:$0xf]  ;;  %v668_v37 = vsel %vm665_vm0, %v666_v25, %v667_v26  ;;  %v671_v39 = vsel %vm665_vm0, %v667_v26, %v649_v15  ;;  %v3511_v47 = vor.u32 %v4561_v29, %v3508_v30 }
  0x85   : > { %995 = vmatpush.bf16.msra.mxu0 %v3507_v1  ;;  %v3612_v40 = vld [vmem:[#allocation7 + $0xf8] sm:$0xf0]  ;;  %v4603_v41 = vld [vmem:[#allocation7 + $0x174] sm:$0xf]  ;;  %v673_v43 = vmul.f32 %v5624_v24, %v671_v39  ;;  %v676_v44 = vpack.c.bf16 %v668_v37, %v668_v37  ;;  %v659_v45 = vsel %vm656_vm3, %v657_v31, %v658_v32  ;;  %v662_v46 = vsel %vm656_vm3, %v648_v14, %v657_v31  ;;  %v4585_v57 = vld [vmem:[#allocation7 + $0xe4] sm:$0xf] }
  0x86   : > { %1009 = vmatpush.bf16.msra.mxu1 %v3571_v6  ;;  %v3676_v42 = vld [vmem:[#allocation7 + $0x178] sm:$0xf0]  ;;  %v663_v48 = vmul.f32 %v5619_v20, %v662_v46  ;;  %v675_v49 = vpack.c.bf16 %v659_v45, %v659_v45  ;;  %v3619_v51 = vor.u32 %v4590_v35, %v3618_v34  ;;  %v3615_v54 = vor.u32 %v4587_v36, %v3612_v40  ;;  %v4559_v60 = vld [vmem:[#allocation7 + $0x14] sm:$0xf]  ;;  %v3604_v63 = vld [vmem:[#allocation7 + $0xe8] sm:$0xf0] }
  0x87   : > { %1023 = vmatpush.bf16.msra.mxu2 %v3635_v7  ;;  %v677_v52 = vpack.c.bf16 %v673_v43, %v673_v43  ;;  %v692_v53 = vunpack.c.l.b16 %v676_v44  ;;  %v3679_v55 = vor.u32 %v4603_v41, %v3676_v42  ;;  %v3500_v61 = vld [vmem:[#allocation7 + $0x18] sm:$0xf0]  ;;  %v4601_v0 = vld [vmem:[#allocation7 + $0x164] sm:$0xf]  ;;  %v3668_v1 = vld [vmem:[#allocation7 + $0x168] sm:$0xf0]  ;;  %v3607_v9 = vor.u32 %v4585_v57, %v3604_v63 }
  0x88   : > { %1036 = vmatpush.bf16.msra.mxu3 %v3519_v23  ;;  %v674_v58 = vpack.c.bf16 %v663_v48, %v663_v48  ;;  %v681_v59 = vunpack.c.l.b16 %v675_v49  ;;  %v5633_v3 = vld [vmem:[%s5579_s10] sm:$0xff]  ;;  %v3503_v5 = vor.u32 %v4559_v60, %v3500_v61  ;;  %v4583_v6 = vld [vmem:[#allocation7 + $0xd4] sm:$0xf]  ;;  %v3596_v7 = vld [vmem:[#allocation7 + $0xd8] sm:$0xf0]  ;;  %v3671_v10 = vor.u32 %v4601_v0, %v3668_v1  ;;  %s5853_s5 = sld [smem:[#allocation32_spill]] }
  0x89   : > { %996 = vmatpush.bf16.msra.mxu0 %v3499_v16  ;;  %v693_v62 = vunpack.c.l.b16 %v677_v52  ;;  %v4599_v8 = vld [vmem:[#allocation7 + $0x154] sm:$0xf]  ;;  %v3660_v12 = vld [vmem:[#allocation7 + $0x158] sm:$0xf0]  ;;  %v4557_v13 = vld [vmem:[#allocation7 + $0x4] sm:$0xf]  ;;  %v3599_v17 = vor.u32 %v4583_v6, %v3596_v7 }
  0x8a   : > { %1010 = vmatpush.bf16.msra.mxu1 %v3563_v27  ;;  %v680_v2 = vunpack.c.l.b16 %v674_v58  ;;  %v3492_v14 = vld [vmem:[#allocation7 + $0x8] sm:$0xf0]  ;;  %v4612_v15 = vld [vmem:[#allocation8 + $0x38] sm:$0xff]  ;;  %v3663_v18 = vor.u32 %v4599_v8, %v3660_v12  ;;  %v4581_v21 = vld [vmem:[#allocation7 + $0xc4] sm:$0xf]  ;;  %vm641_vm4 = vcmp.eq.s32.totalorder %v5611_v56, 15 }
  0x8b   : > { %1024 = vmatpush.bf16.msra.mxu2 %v3627_v28  ;;  %v5635_v4 = vpack.c.b16 %v693_v62, %v692_v53  ;;  %v3495_v16 = vor.u32 %v4557_v13, %v3492_v14  ;;  %v3588_v22 = vld [vmem:[#allocation7 + $0xc8] sm:$0xf0]  ;;  %v4597_v23 = vld [vmem:[#allocation7 + $0x144] sm:$0xf]  ;;  %v4611_v26 = vld [vmem:[#allocation8 + $0x30] sm:$0xff]  ;;  %vm634_vm5 = vcmp.eq.s32.totalorder %v5608_v38, 0 }
  0x8c   : > { %1037 = vmatpush.bf16.msra.mxu3 %v3511_v47  ;;  %v682_v11 = vpack.c.b16 %v681_v59, %v680_v2  ;;  %v3652_v25 = vld [vmem:[#allocation7 + $0x148] sm:$0xf0]  ;;  %v3591_v27 = vor.u32 %v4581_v21, %v3588_v22  ;;  %v4579_v29 = vld [vmem:[#allocation7 + $0xb4] sm:$0xf]  ;;  %v3580_v30 = vld [vmem:[#allocation7 + $0xb8] sm:$0xf0] }
  0x8d   : > { %997 = vmatpush.bf16.msra.mxu0 %v3491_v33  ;;  %v3655_v28 = vor.u32 %v4597_v23, %v3652_v25  ;;  %v4595_v31 = vld [vmem:[#allocation7 + $0x134] sm:$0xf]  ;;  %v3644_v32 = vld [vmem:[#allocation7 + $0x138] sm:$0xf0]  ;;  %v3583_v33 = vor.u32 %v4579_v29, %v3580_v30  ;;  %v4577_v35 = vld [vmem:[#allocation7 + $0xa4] sm:$0xf] }
  0x8e   : > { %1011 = vmatpush.bf16.msra.mxu1 %v3555_v50  ;;  %v3647_v34 = vor.u32 %v4595_v31, %v3644_v32  ;;  %v3572_v36 = vld [vmem:[#allocation7 + $0xa8] sm:$0xf0]  ;;  %v4593_v37 = vld [vmem:[#allocation7 + $0x124] sm:$0xf]  ;;  %v4575_v42 = vld [vmem:[#allocation7 + $0x94] sm:$0xf] }
  0x8f   : > { %1025 = vmatpush.bf16.msra.mxu2 %v3619_v51  ;;  %v3636_v39 = vld [vmem:[#allocation7 + $0x128] sm:$0xf0]  ;;  %v3575_v40 = vor.u32 %v4577_v35, %v3572_v36  ;;  %v3564_v43 = vld [vmem:[#allocation7 + $0x98] sm:$0xf0]  ;;  %v4591_v44 = vld [vmem:[#allocation7 + $0x114] sm:$0xf] }
  0x90   : > { %998 = vmatmul.bf16.vlgmr.msra.gmra.mxu0 %v682_v11  ;;  %1038 = vmatpush.bf16.msra.mxu3 %v3503_v5  ;;  %v3639_v41 = vor.u32 %v4593_v37, %v3636_v39  ;;  %v3628_v45 = vld [vmem:[#allocation7 + $0x118] sm:$0xf0]  ;;  %v3567_v46 = vor.u32 %v4575_v42, %v3564_v43  ;;  %v4573_v48 = vld [vmem:[#allocation7 + $0x84] sm:$0xf]  ;;  %v3556_v49 = vld [vmem:[#allocation7 + $0x88] sm:$0xf0] }
  0x91   : > { %1046 = vmatpush.bf16.msrb.mxu0 %v3615_v54  ;;  %1012 = vmatmul.bf16.vlgmr.msra.gmra.mxu1 %v5633_v3  ;;  %v3631_v47 = vor.u32 %v4591_v44, %v3628_v45  ;;  %v4589_v50 = vld [vmem:[#allocation7 + $0x104] sm:$0xf]  ;;  %v3620_v51 = vld [vmem:[#allocation7 + $0x108] sm:$0xf0]  ;;  %v3559_v52 = vor.u32 %v4573_v48, %v3556_v49  ;;  %v4620_v57 = vld [vmem:[#allocation8 + $0x78] sm:$0xff]  ;;  %s5854_s6 = sld [smem:[#allocation34_spill]] }
  0x92   : > { %1060 = vmatpush.bf16.msrb.mxu1 %v3679_v55  ;;  %1026 = vmatmul.bf16.vlgmr.msra.gmra.mxu2 %v5635_v4  ;;  %v3623_v53 = vor.u32 %v4589_v50, %v3620_v51  ;;  %v4610_v54 = vld [vmem:[#allocation8 + $0x28] sm:$0xff]  ;;  %v4609_v55 = vld [vmem:[#allocation8 + $0x20] sm:$0xff]  ;;  %v4608_v58 = vld [vmem:[#allocation8 + $0x18] sm:$0xff]  ;;  %s3479_s20 = sshll.u32 %s5575_s19, 4  ;;  %s4821_s4 = sshll.u32 %s5424_s15, 4 }
  0x93   : > { %1538 = vmatpush.bf16.msrb.mxu2 %v4612_v15  ;;  %v4619_v59 = vld [vmem:[#allocation8 + $0x70] sm:$0xff]  ;;  %v4618_v61 = vld [vmem:[#allocation8 + $0x68] sm:$0xff]  ;;  %v4628_v62 = vld [vmem:[#allocation8 + $0xb8] sm:$0xff]  ;;  %s5855_s10 = sld [smem:[#allocation35_spill]]  ;;  %s615_s16 = scalar_lea.vmem [#allocation17], %s3479_s20 }
  0x94   : > { %1039 = vmatpush.bf16.msra.mxu3 %v3495_v16  ;;  %v4607_v60 = vld [vmem:[#allocation8 + $0x10] sm:$0xff]  ;;  %v4636_v63 = vld [vmem:[#allocation8 + $0xf8] sm:$0xff]  ;;  %v4606_v0 = vld [vmem:[#allocation8 + $0x8] sm:$0xff]  ;;  %s3276_s15 = scalar_lea.sflag [#allocation4], %s5575_s19 }
  0x95   : > { %1047 = vmatpush.bf16.msrb.mxu0 %v3607_v9  ;;  %v4617_v1 = vld [vmem:[#allocation8 + $0x60] sm:$0xff]  ;;  %v4627_v2 = vld [vmem:[#allocation8 + $0xb0] sm:$0xff]  ;;  %v4616_v5 = vld [vmem:[#allocation8 + $0x58] sm:$0xff] }
  0x96   : > { %1061 = vmatpush.bf16.msrb.mxu1 %v3671_v10  ;;  %v4644_v6 = vld [vmem:[#allocation8 + $0x138] sm:$0xff]  ;;  %v4626_v7 = vld [vmem:[#allocation8 + $0xa8] sm:$0xff]  ;;  %v4615_v9 = vld [vmem:[#allocation8 + $0x50] sm:$0xff] }
  0x97   : > { %1539 = vmatpush.bf16.msrb.mxu2 %v4611_v26  ;;  %1040 = vmatmul.bf16.vlgmr.msra.gmra.mxu3 %v682_v11  ;;  %v4634_v8 = vld [vmem:[#allocation8 + $0xe8] sm:$0xff]  ;;  %v4643_v10 = vld [vmem:[#allocation8 + $0x130] sm:$0xff]  ;;  %v4625_v11 = vld [vmem:[#allocation8 + $0xa0] sm:$0xff] }
  0x98   : > { %1552 = vmatpush.bf16.msrb.mxu3 %v4620_v57  ;;  %v4633_v12 = vld [vmem:[#allocation8 + $0xe0] sm:$0xff]  ;;  %v4614_v13 = vld [vmem:[#allocation8 + $0x48] sm:$0xff]  ;;  %v4624_v15 = vld [vmem:[#allocation8 + $0x98] sm:$0xff] }
  0x99   : > { %1048 = vmatpush.bf16.msrb.mxu0 %v3599_v17  ;;  %v4642_v14 = vld [vmem:[#allocation8 + $0x128] sm:$0xff]  ;;  %v4632_v16 = vld [vmem:[#allocation8 + $0xd8] sm:$0xff]  ;;  %v4613_v17 = vld [vmem:[#allocation8 + $0x40] sm:$0xff]  ;;  %s3287_s11 = scalar_lea.hbm %s5855_s10, %s4821_s4  ;;  %s5246_s22 = scalar_lea.hbm %s5855_s10, 32 }
  0x9a   : > { %1062 = vmatpush.bf16.msrb.mxu1 %v3663_v18  ;;  %v4641_v18 = vld [vmem:[#allocation8 + $0x120] sm:$0xff]  ;;  %v4652_v21 = vld [vmem:[#allocation8 + $0x178] sm:$0xff]  ;;  %v4623_v22 = vld [vmem:[#allocation8 + $0x90] sm:$0xff]  ;;  %s3290_s18 = sshll.u32 %s3287_s11, 4  ;;  %s3291_s18 = int_to_ptr.hbm [resolvable:$true] %s3290_s18 }
  0x9b   : > { %1540 = vmatpush.bf16.msrb.mxu2 %v4610_v54  ;;  %v4631_v23 = vld [vmem:[#allocation8 + $0xd0] sm:$0xff]  ;;  %v4640_v25 = vld [vmem:[#allocation8 + $0x118] sm:$0xff]  ;;  %v4650_v32 = vld [vmem:[#allocation8 + $0x168] sm:$0xff]  ;;  %s5240_s29 = sshra.s32 %s3291_s18, 4  ;;  %s5241_s29 = int_to_ptr.hbm [resolvable:$true] %s5240_s29 }
  0x9c   : > { %1553 = vmatpush.bf16.msrb.mxu3 %v4619_v59  ;;  %v4651_v26 = vld [vmem:[#allocation8 + $0x170] sm:$0xff]  ;;  %v4629_v35 = vld [vmem:[#allocation8 + $0xc0] sm:$0xff]  ;;  %v4638_v37 = vld [vmem:[#allocation8 + $0x108] sm:$0xff]  ;;  %s5242_s8 = scalar_lea.hbm %s5241_s29, 16  ;;  %p5247_p7 = scmp.lt.s32.totalorder %s5241_s29, %s5855_s10 }
  0x9d   : > { %1049 = vmatpush.bf16.msrb.mxu0 %v3591_v27  ;;  %v4622_v27 = vld [vmem:[#allocation8 + $0x88] sm:$0xff]  ;;  %v4639_v31 = vld [vmem:[#allocation8 + $0x110] sm:$0xff]  ;;  %v4660_v36 = vld [vmem:[#allocation11 + $0x38] sm:$0xff]  ;;  %p5243_p1 = scmp.ne.s32.totalorder %s5241_s29, %s5242_s8  ;;  %p5248_p9 = scmp.lt.s32.totalorder %s5246_s22, %s5242_s8 }
  0x9e   : > { %1063 = vmatpush.bf16.msrb.mxu1 %v3655_v28  ;;  %v4630_v28 = vld [vmem:[#allocation8 + $0xc8] sm:$0xff]  ;;  %v4659_v42 = vld [vmem:[#allocation11 + $0x30] sm:$0xff]  ;;  %v4637_v43 = vld [vmem:[#allocation8 + $0x100] sm:$0xff] }
  0x9f   : > { %1541 = vmatpush.bf16.msrb.mxu2 %v4609_v55  ;;  %v4648_v45 = vld [vmem:[#allocation8 + $0x158] sm:$0xff]  ;;  %v4658_v51 = vld [vmem:[#allocation11 + $0x28] sm:$0xff]  ;;  %p5244_p3 = pnand %p5243_p1, %p5515_p0  ;;  %p5249_p8 = por %p5248_p9, %p5247_p7 }
  0xa0   : > { %1554 = vmatpush.bf16.msrb.mxu3 %v4618_v61  ;;  %v4646_v59 = vld [vmem:[#allocation8 + $0x148] sm:$0xff] }
  0xa1   : > { %1050 = vmatpush.bf16.msrb.mxu0 %v3583_v33  ;;  %v5644_v33 = vld [vmem:[%s5807_s3] sm:$0x3]  ;;  %p5245_p13 = pneg %p5244_p3 }
  0xa2   : > { %1064 = vmatpush.bf16.msrb.mxu1 %v3647_v34  ;;  %v4621_v34 = vld [vmem:[#allocation8 + $0x80] sm:$0xff]  ;;  %v746_v39 = vperm.slane %v5644_v33, 0  ;;  %v747_v50 = vperm.slane %v5644_v33, 1 }
  0xa3   : > { %1542 = vmatpush.bf16.msrb.mxu2 %v4608_v58  ;;  %v4657_v58 = vld [vmem:[#allocation11 + $0x20] sm:$0xff]  ;;  %p5250_p5 = pnand %p5249_p8, %p5245_p13 }
  0xa4   : > { %1555 = vmatpush.bf16.msrb.mxu3 %v4617_v1 }
  0xa5   : > { %1051 = vmatpush.bf16.msrb.mxu0 %v3575_v40  ;;  %v4649_v40 = vld [vmem:[#allocation8 + $0x160] sm:$0xff] }
  0xa6   : > { %1065 = vmatpush.bf16.msrb.mxu1 %v3639_v41  ;;  %v4668_v41 = vld [vmem:[#allocation11 + $0x78] sm:$0xff] }
  0xa7   : > { %1543 = vmatpush.bf16.msrb.mxu2 %v4607_v60  ;;  %v4665_v60 = vld [vmem:[#allocation11 + $0x60] sm:$0xff] }
  0xa8   : > { %1556 = vmatpush.bf16.msrb.mxu3 %v4616_v5 }
  0xa9   : > { %1052 = vmatpush.bf16.msrb.mxu0 %v3567_v46  ;;  %v4667_v46 = vld [vmem:[#allocation11 + $0x70] sm:$0xff] }
  0xaa   : > { %1066 = vmatpush.bf16.msrb.mxu1 %v3631_v47 }
  0xab   : > { %1544 = vmatpush.bf16.msrb.mxu2 %v4606_v0 }
  0xac   : > { %1557 = vmatpush.bf16.msrb.mxu3 %v4615_v9 }
  0xad   : > { %1053 = vmatpush.bf16.msrb.mxu0 %v3559_v52  ;;  %v4647_v52 = vld [vmem:[#allocation8 + $0x150] sm:$0xff] }
  0xae   : > { %1067 = vmatpush.bf16.msrb.mxu1 %v3623_v53  ;;  %v4666_v53 = vld [vmem:[#allocation11 + $0x68] sm:$0xff] }
  0xb0   : > { %1054 = vmatmul.bf16.vlgmr.msrb.gmra.mxu0 %v5633_v3  ;;  %v4635_v3 = vld [vmem:[#allocation8 + $0xf0] sm:$0xff]  ;;  %1558 = vmatpush.bf16.msrb.mxu3 %v4614_v13 }
  0xb1   : > { %1068 = vmatmul.bf16.vlgmr.msrb.gmra.mxu1 %v5635_v4  ;;  %1566 = vmatpush.bf16.msra.mxu0 %v4628_v62  ;;  %v4605_v4 = vld [vmem:[#allocation8] sm:$0xff] }
  0xb2   : > { %1580 = vmatpush.bf16.msra.mxu1 %v4636_v63  ;;  %1545 = vmatpush.bf16.msrb.mxu2 %v4605_v4  ;;  %v4664_v4 = vld [vmem:[#allocation11 + $0x58] sm:$0xff] }
  0xb4   : > { %1559 = vmatpush.bf16.msrb.mxu3 %v4613_v17 }
  0xb5   : > { %1567 = vmatpush.bf16.msra.mxu0 %v4627_v2  ;;  %v4656_v2 = vld [vmem:[#allocation11 + $0x18] sm:$0xff] }
  0xb6   : > { %1581 = vmatpush.bf16.msra.mxu1 %v4635_v3  ;;  %1594 = vmatpush.bf16.msra.mxu2 %v4644_v6  ;;  %v4645_v3 = vld [vmem:[#allocation8 + $0x140] sm:$0xff] }
  0xb8   : > { %1608 = vmatpush.bf16.msra.mxu3 %v4652_v21 }
  0xb9   : > { %1568 = vmatpush.bf16.msra.mxu0 %v4626_v7 }
  0xba   : > { %1582 = vmatpush.bf16.msra.mxu1 %v4634_v8  ;;  %1595 = vmatpush.bf16.msra.mxu2 %v4643_v10 }
  0xbc   : > { %1609 = vmatpush.bf16.msra.mxu3 %v4651_v26 }
  0xbd   : > { %1569 = vmatpush.bf16.msra.mxu0 %v4625_v11  ;;  %v4655_v11 = vld [vmem:[#allocation11 + $0x10] sm:$0xff] }
  0xbe   : > { %1583 = vmatpush.bf16.msra.mxu1 %v4633_v12  ;;  %1596 = vmatpush.bf16.msra.mxu2 %v4642_v14 }
  0xc0   : > { %1610 = vmatpush.bf16.msra.mxu3 %v4650_v32 }
  0xc1   : > { %1570 = vmatpush.bf16.msra.mxu0 %v4624_v15 }
  0xc2   : > { %1584 = vmatpush.bf16.msra.mxu1 %v4632_v16  ;;  %1597 = vmatpush.bf16.msra.mxu2 %v4641_v18  ;;  %v650_v16 = vld [vmem:[%s5586_s12] sm:$0xff]  }
  0xc3   : > { %v4663_v18 = vld [vmem:[#allocation11 + $0x50] sm:$0xff] }
  0xc4   : > { %1611 = vmatpush.bf16.msra.mxu3 %v4649_v40 }
  0xc5   : > { %1571 = vmatpush.bf16.msra.mxu0 %v4623_v22 }
  0xc6   : > { %1585 = vmatpush.bf16.msra.mxu1 %v4631_v23  ;;  %1598 = vmatpush.bf16.msra.mxu2 %v4640_v25  ;;  %v4654_v23 = vld [vmem:[#allocation11 + $0x8] sm:$0xff] }
  0xc8   : > { %1612 = vmatpush.bf16.msra.mxu3 %v4648_v45 }
  0xc9   : > { %1572 = vmatpush.bf16.msra.mxu0 %v4622_v27  ;;  %v4662_v27 = vld [vmem:[#allocation11 + $0x48] sm:$0xff] }
  0xca   : > { %1586 = vmatpush.bf16.msra.mxu1 %v4630_v28  ;;  %1599 = vmatpush.bf16.msra.mxu2 %v4639_v31  ;;  %v5659_v28 = vunpack.c.l.bf16 %v650_v16 }
  0xcc   : > { %1613 = vmatpush.bf16.msra.mxu3 %v4647_v52  ;;  %v1626_v40 = vrot.slane %v5659_v28, 7 }
  0xcd   : > { %1573 = vmatpush.bf16.msra.mxu0 %v4621_v34 }
  0xce   : > { %1587 = vmatpush.bf16.msra.mxu1 %v4629_v35  ;;  %1600 = vmatpush.bf16.msra.mxu2 %v4638_v37  ;;  %v4653_v35 = vld [vmem:[#allocation11] sm:$0xff]  ;;  %v1631_v52 = vsel %vm656_vm3, %v5659_v28, %v1626_v40 }
  0xcf   : > { %v4661_v37 = vld [vmem:[#allocation11 + $0x40] sm:$0xff] }
  0xd0   : > { %1614 = vmatpush.bf16.msra.mxu3 %v4646_v59 }
  0xd1   : > { %1860 = vmatpush.bf16.msrb.mxu0 %v4660_v36 }
  0xd2   : > { %1874 = vmatpush.bf16.msrb.mxu1 %v4668_v41  ;;  %1601 = vmatpush.bf16.msra.mxu2 %v4637_v43 }
  0xd4   : > { %1615 = vmatpush.bf16.msra.mxu3 %v4645_v3 }
  0xd5   : > { %1861 = vmatpush.bf16.msrb.mxu0 %v4659_v42 }
  0xd6   : > { %1875 = vmatpush.bf16.msrb.mxu1 %v4667_v46 }
  0xd9   : > { %1862 = vmatpush.bf16.msrb.mxu0 %v4658_v51 }
  0xda   : > { %1876 = vmatpush.bf16.msrb.mxu1 %v4666_v53 }
  0xdd   : > { %1863 = vmatpush.bf16.msrb.mxu0 %v4657_v58 }
  0xde   : > { %1877 = vmatpush.bf16.msrb.mxu1 %v4665_v60 }
  0xe1   : > { %1864 = vmatpush.bf16.msrb.mxu0 %v4656_v2 }
  0xe2   : > { %1878 = vmatpush.bf16.msrb.mxu1 %v4664_v4  ;;  %v4675_v4 = vld [vmem:[#allocation11 + $0xb0] sm:$0xff] }
  0xe5   : > { %1865 = vmatpush.bf16.msrb.mxu0 %v4655_v11 }
  0xe6   : > { %1879 = vmatpush.bf16.msrb.mxu1 %v4663_v18 }
  0xe9   : > { %1866 = vmatpush.bf16.msrb.mxu0 %v4654_v23 }
  0xea   : > { %1880 = vmatpush.bf16.msrb.mxu1 %v4662_v27 }
  0xed   : > { %1867 = vmatpush.bf16.msrb.mxu0 %v4653_v35  ;;  %v4674_v35 = vld [vmem:[#allocation11 + $0xa8] sm:$0xff] }
  0xee   : > { %1881 = vmatpush.bf16.msrb.mxu1 %v4661_v37 }
 0x10d   : > { %v999_v29 = vpop.f32.mrf.mxu0 }
 0x10e   : > { %v1013_v30 = vpop.f32.mrf.mxu1  ;;  %v1000_v44 = vadd.f32 %v999_v29, %v746_v39 }
 0x110   : > { %v1014_v55 = vadd.f32 %v1013_v30, %v1000_v44 }
 0x115   : > { %v1001_v47 = vpop.f32.mrf.mxu0  ;;  %v1027_v49 = vpop.f32.mrf.mxu2 }
 0x116   : > { %v1015_v48 = vpop.f32.mrf.mxu1  ;;  %v1002_v61 = vadd.f32 %v1001_v47, %v746_v39  ;;  %v1028_v62 = vadd.f32 %v1027_v49, %v1014_v55  ;;  %v5670_v39 = vunpack.c.h.bf16 %v650_v16  ;;  %v4706_v16 = vld [vmem:[#allocation13 + $0xe4] sm:$0xf0] }
 0x118   : > { %v1016_v5 = vadd.f32 %v1015_v48, %v1002_v61  ;;  %v5648_v6 = vmax.f32 %v1028_v62, 0.0  ;;  %v1627_v51 = vrot.slane %v5670_v39, 7  ;;  %v4676_v62 = vld [vmem:[#allocation11 + $0xb8] sm:$0xff] }
 0x11a   : > { %v1041_v54 = vpop.f32.mrf.mxu3  ;;  %v1082_v13 = vrot.slane %v5648_v6, 7  ;;  %v1628_v2 = vsel %vm656_vm3, %v1626_v40, %v1627_v51  ;;  %v1098_v23 = vrot.slane %v5648_v6, 1  ;;  %v4672_v51 = vld [vmem:[#allocation11 + $0x98] sm:$0xff] }
 0x11b   : > { %v1042_v57 = vadd.f32 %v1041_v54, %v747_v50 }
 0x11c   : > { %v1092_v29 = vsel %vm656_vm3, %v5648_v6, %v1082_v13 }
 0x11d   : > { %v1029_v7 = vpop.f32.mrf.mxu2  ;;  %v1094_v36 = vmul.f32 %v5619_v20, %v1092_v29  ;;  %v4158_v29 = vld [vmem:[#allocation13 + $0x170] sm:$0xf] }
 0x11e   : > { %v1030_v12 = vadd.f32 %v1029_v7, %v1016_v5  ;;  %v4094_v5 = vld [vmem:[#allocation13 + $0xf0] sm:$0xf]  ;;  %v4708_v7 = vld [vmem:[#allocation13 + $0xf4] sm:$0xf0] }
 0x120   : > { %v5657_v25 = vmax.f32 %v1030_v12, 0.0  ;;  %v1643_v12 = vpack.c.bf16 %v1628_v2, %v1628_v2 }
 0x122   : > { %v1043_v9 = vpop.f32.mrf.mxu3  ;;  %v1084_v31 = vrot.slane %v5657_v25, 7  ;;  %v1099_v61 = vrot.slane %v5657_v25, 1 }
 0x123   : > { %v1044_v14 = vadd.f32 %v1043_v9, %v747_v50 }
 0x124   : > { %v1085_v44 = vsel %vm656_vm3, %v1082_v13, %v1084_v31  ;;  %v1108_v9 = vsel %vm665_vm0, %v1099_v61, %v5657_v25  ;;  %v4095_v13 = vor.u32 %v4708_v7, %v4094_v5  ;;  %v4688_v5 = vld [vmem:[#allocation13 + $0x54] sm:$0xf0] }
 0x12d   : > { %v1055_v63 = vpop.f32.mrf.mxu0 }
 0x12e   : > { %v1069_v0 = vpop.f32.mrf.mxu1  ;;  %v1056_v1 = vadd.f32 %v1055_v63, %v1042_v57  ;;  %v1632_v63 = vmul.f32 %v5619_v20, %v1631_v52  ;;  %v1634_v52 = vrot.slane %v5659_v28, 1  ;;  %v4032_v28 = vld [vmem:[#allocation13 + $0x78] sm:$0xf0] }
 0x130   : > { %v1070_v8 = vadd.f32 %v1069_v0, %v1056_v1  ;;  %v1642_v11 = vpack.c.bf16 %v1632_v63, %v1632_v63  ;;  %v4691_v63 = vld [vmem:[#allocation13 + $0x74] sm:$0xf] }
 0x131   : > { %v4035_v2 = vor.u32 %v4691_v63, %v4032_v28  ;;  %v4694_v63 = vld [vmem:[#allocation13 + $0x84] sm:$0xf0] }
 0x132   : > { %v5650_v10 = vmax.f32 %v1070_v8, 0.0  ;;  %v4030_v8 = vld [vmem:[#allocation13 + $0x70] sm:$0xf]  ;;  %v1648_v37 = vunpack.c.l.b16 %v1642_v11 }
 0x134   : > { %v1083_v15 = vrot.slane %v5650_v10, 7  ;;  %v1116_v32 = vpack.c.bf16 %v5650_v10, %v5648_v6  ;;  %v1649_v6 = vunpack.c.l.b16 %v1643_v12  ;;  %v4150_v12 = vld [vmem:[#allocation13 + $0x160] sm:$0xf] }
 0x135   : > { %v1057_v17 = vpop.f32.mrf.mxu0 }
 0x136   : > { %v1093_v21 = vsel %vm656_vm3, %v5650_v10, %v1083_v15  ;;  %v1058_v22 = vadd.f32 %v1057_v17, %v1044_v14  ;;  %v1071_v26 = vpop.f32.mrf.mxu1  ;;  %v1132_v43 = vunpack.c.l.b16 %v1116_v32  ;;  %v1133_v47 = vunpack.c.h.b16 %v1116_v32  ;;  %v4692_v14 = vld [vmem:[#allocation13 + $0x74] sm:$0xf0]  ;;  %v4078_v32 = vld [vmem:[#allocation13 + $0xd0] sm:$0xf] }
 0x137   : > { %v1095_v33 = vmul.f32 %v5619_v20, %v1093_v21  ;;  %v4031_v18 = vor.u32 %v4692_v14, %v4030_v8  ;;  %v4022_v21 = vld [vmem:[#allocation13 + $0x60] sm:$0xf]  ;;  %v4689_v14 = vld [vmem:[#allocation13 + $0x64] sm:$0xf] }
 0x138   : > { %v1072_v30 = vadd.f32 %v1071_v26, %v1058_v22  ;;  %v4690_v22 = vld [vmem:[#allocation13 + $0x64] sm:$0xf0]  ;;  %v1101_v26 = vrot.slane %v5650_v10, 1  ;;  %v1100_v10 = vsel %vm665_vm0, %v1098_v23, %v1099_v61  ;;  %v4070_v8 = vld [vmem:[#allocation13 + $0xc0] sm:$0xf] }
 0x139   : > { %v1114_v45 = vpack.c.bf16 %v1095_v33, %v1094_v36  ;;  %v4023_v31 = vor.u32 %v4690_v22, %v4022_v21  ;;  %v4704_v33 = vld [vmem:[#allocation13 + $0xd4] sm:$0xf0]  ;;  %v4062_v23 = vld [vmem:[#allocation13 + $0xb0] sm:$0xf] }
 0x13a   : > { %v5667_v34 = vmax.f32 %v1072_v30, 0.0  ;;  %v1112_v30 = vmul.f32 %v5624_v24, %v1108_v9  ;;  %v4702_v9 = vld [vmem:[#allocation13 + $0xc4] sm:$0xf0] }
 0x13b   : > { %v1122_v57 = vunpack.c.l.b16 %v1114_v45  ;;  %v1123_v59 = vunpack.c.h.b16 %v1114_v45  ;;  %v1635_v45 = vrot.slane %v5670_v39, 1  ;;  %v4071_v11 = vor.u32 %v4702_v9, %v4070_v8  ;;  %v3974_v8 = vld [vmem:[#allocation13] sm:$0xf]  ;;  %v4678_v9 = vld [vmem:[#allocation13 + $0x4] sm:$0xf0] }
 0x13c   : > { %v1086_v41 = vrot.slane %v5667_v34, 7  ;;  %v1117_v42 = vpack.c.bf16 %v5667_v34, %v5657_v25  ;;  %v1102_v53 = vrot.slane %v5667_v34, 1  ;;  %v4724_v25 = vld [vmem:[#allocation13 + $0x174] sm:$0xf0] }
 0x13e   : > { %v1134_v46 = vunpack.c.l.b16 %v1117_v42  ;;  %v1135_v48 = vunpack.c.h.b16 %v1117_v42  ;;  %v1087_v49 = vsel %vm656_vm3, %v1083_v15, %v1086_v41  ;;  %v1109_v3 = vsel %vm665_vm0, %v1102_v53, %v5667_v34  ;;  %v4086_v15 = vld [vmem:[#allocation13 + $0xe0] sm:$0xf] }
 0x13f   : > { %v1115_v50 = vpack.c.bf16 %v1087_v49, %v1085_v44  ;;  %v1113_v17 = vmul.f32 %v5624_v24, %v1109_v3  ;;  %v4087_v27 = vor.u32 %v4706_v16, %v4086_v15  ;;  %v4159_v34 = vor.u32 %v4724_v25, %v4158_v29  ;;  %v4024_v16 = vld [vmem:[#allocation13 + $0x68] sm:$0xf0]  ;;  %v4720_v25 = vld [vmem:[#allocation13 + $0x154] sm:$0xf0] }
 0x140   : > { %v1136_v54 = vpack.c.b16 %v1134_v46, %v1132_v43  ;;  %v1137_v55 = vpack.c.b16 %v1135_v48, %v1133_v47  ;;  %v1103_v36 = vsel %vm665_vm0, %v1101_v26, %v1102_v53  ;;  %v4079_v41 = vor.u32 %v4704_v33, %v4078_v32  ;;  %v4673_v43 = vld [vmem:[#allocation11 + $0xa0] sm:$0xff]  ;;  %v4556_v48 = vld [vmem:[%s5586_s12] sm:$0xff]  ;;  %s3288_s12 = sshll.u32 %s615_s16, 4  ;;  %s3289_s12 = int_to_ptr.vmem [resolvable:$true] %s3288_s12 }
 0x141   : > { %v1124_v58 = vunpack.c.l.b16 %v1115_v50  ;;  %v1125_v60 = vunpack.c.h.b16 %v1115_v50  ;;  %v1119_v40 = vpack.c.bf16 %v1113_v17, %v1112_v30  ;;  %v1118_v42 = vpack.c.bf16 %v1103_v36, %v1100_v10  ;;  %v4006_v17 = vld [vmem:[#allocation13 + $0x40] sm:$0xf]  ;;  %v4700_v26 = vld [vmem:[#allocation13 + $0xb4] sm:$0xf0]  ;;  %v4687_v30 = vld [vmem:[#allocation13 + $0x54] sm:$0xf] }
 0x142   : > { %1574 = vmatmul.bf16.vlgmr.msra.gmra.mxu0 %v1136_v54  ;;  %1588 = vmatmul.bf16.vlgmr.msra.gmra.mxu1 %v1137_v55  ;;  %v1650_v44 = vpack.c.b16 %v1649_v6, %v1648_v37  ;;  %v1639_v53 = vsel %vm665_vm0, %v1635_v45, %v5670_v39  ;;  %v4669_v39 = vld [vmem:[#allocation11 + $0x80] sm:$0xff]  ;;  %v4027_v21 = vor.u32 %v4689_v14, %v4024_v16  ;;  %v4698_v6 = vld [vmem:[#allocation13 + $0xa4] sm:$0xf0]  ;;  %v4096_v14 = vld [vmem:[#allocation13 + $0xf8] sm:$0xf0] }
 0x143   : > { %v1126_v0 = vpack.c.b16 %v1124_v58, %v1122_v57  ;;  %v1127_v1 = vpack.c.b16 %v1125_v60, %v1123_v59  ;;  %2262 = vmatpush.bf16.msra.mxu0 %v4095_v13  ;;  %2276 = vmatpush.bf16.msra.mxu1 %v4159_v34  ;;  %v1144_v46 = vunpack.c.l.b16 %v1119_v40  ;;  %v1145_v47 = vunpack.c.h.b16 %v1119_v40  ;;  %v4671_v58 = vld [vmem:[#allocation11 + $0x90] sm:$0xff]  ;;  %v4722_v13 = vld [vmem:[#allocation13 + $0x164] sm:$0xf0]  ;;  %v4054_v37 = vld [vmem:[#allocation13 + $0xa0] sm:$0xf] }
 0x144   : > { %v1142_v49 = vunpack.c.l.b16 %v1118_v42  ;;  %v1143_v50 = vunpack.c.h.b16 %v1118_v42  ;;  %v1641_v57 = vmul.f32 %v5624_v24, %v1639_v53  ;;  %v1636_v59 = vsel %vm665_vm0, %v1634_v52, %v1635_v45  ;;  %v3998_v34 = vld [vmem:[#allocation13 + $0x30] sm:$0xf]  ;;  %v4134_v10 = vld [vmem:[#allocation13 + $0x140] sm:$0xf]  ;;  %v4685_v42 = vld [vmem:[#allocation13 + $0x44] sm:$0xf] }
 0x145   : > { %1546 = vmatmul.bf16.vlgmr.msrb.gmra.mxu2 %v1126_v0  ;;  %1560 = vmatmul.bf16.vlgmr.msrb.gmra.mxu3 %v1127_v1  ;;  %v1644_v60 = vpack.c.bf16 %v1636_v59, %v1636_v59  ;;  %v4151_v15 = vor.u32 %v4722_v13, %v4150_v12  ;;  %v4063_v29 = vor.u32 %v4700_v26, %v4062_v23  ;;  %v3990_v45 = vld [vmem:[#allocation13 + $0x20] sm:$0xf]  ;;  %v4126_v52 = vld [vmem:[#allocation13 + $0x130] sm:$0xf]  ;;  %v4716_v53 = vld [vmem:[#allocation13 + $0x134] sm:$0xf0] }
 0x146   : > { %1888 = vmatpush.bf16.msrb.mxu2 %v4676_v62  ;;  %2248 = vmatpush.bf16.msrb.mxu3 %v4031_v18  ;;  %v1146_v54 = vpack.c.b16 %v1144_v46, %v1142_v49  ;;  %v1147_v55 = vpack.c.b16 %v1145_v47, %v1143_v50  ;;  %v1645_v61 = vpack.c.bf16 %v1641_v57, %v1641_v57  ;;  %v4670_v62 = vld [vmem:[#allocation11 + $0x88] sm:$0xff]  ;;  %v4046_v49 = vld [vmem:[#allocation13 + $0x90] sm:$0xf]  ;;  %v4696_v50 = vld [vmem:[#allocation13 + $0x94] sm:$0xf0] }
 0x147   : > { %2263 = vmatpush.bf16.msra.mxu0 %v4087_v27  ;;  %v1660_v0 = vunpack.c.l.b16 %v1644_v60  ;;  %v4686_v18 = vld [vmem:[#allocation13 + $0x44] sm:$0xf0]  ;;  %v4142_v27 = vld [vmem:[#allocation13 + $0x150] sm:$0xf]  ;;  %2277 = vmatpush.bf16.msra.mxu1 %v4151_v15  ;;  %v4055_v40 = vor.u32 %v4698_v6, %v4054_v37  ;;  %v4000_v57 = vld [vmem:[#allocation13 + $0x38] sm:$0xf0]  ;;  %v3975_v12 = vor.u32 %v4678_v9, %v3974_v8 }
 0x148   : > { %v1661_v1 = vunpack.c.l.b16 %v1645_v61  ;;  %v4007_v22 = vor.u32 %v4686_v18, %v4006_v17  ;;  %v4143_v32 = vor.u32 %v4720_v25, %v4142_v27  ;;  %v4682_v46 = vld [vmem:[#allocation13 + $0x24] sm:$0xf0]  ;;  %v4680_v59 = vld [vmem:[#allocation13 + $0x14] sm:$0xf0]  ;;  %v4707_v13 = vld [vmem:[#allocation13 + $0xf4] sm:$0xf] }
 0x149   : > { %v4099_v15 = vor.u32 %v4707_v13, %v4096_v14  ;;  %v4721_v16 = vld [vmem:[#allocation13 + $0x164] sm:$0xf]  ;;  %v4152_v17 = vld [vmem:[#allocation13 + $0x168] sm:$0xf0]  ;;  %v4679_v23 = vld [vmem:[#allocation13 + $0x14] sm:$0xf] }
 0x14a   : > { %1889 = vmatpush.bf16.msrb.mxu2 %v4675_v4  ;;  %2249 = vmatpush.bf16.msrb.mxu3 %v4023_v31  ;;  %v1662_v3 = vpack.c.b16 %v1661_v1, %v1660_v0  ;;  %v4014_v4 = vld [vmem:[#allocation13 + $0x50] sm:$0xf]  ;;  %v4016_v31 = vld [vmem:[#allocation13 + $0x58] sm:$0xf0]  ;;  %v4723_v0 = vld [vmem:[#allocation13 + $0x174] sm:$0xf]  ;;  %v4155_v18 = vor.u32 %v4721_v16, %v4152_v17 }
 0x14b   : > { %2264 = vmatpush.bf16.msra.mxu0 %v4079_v41  ;;  %v4015_v7 = vor.u32 %v4688_v5, %v4014_v4  ;;  %v4019_v33 = vor.u32 %v4687_v30, %v4016_v31  ;;  %2278 = vmatpush.bf16.msra.mxu1 %v4143_v32  ;;  %v4718_v41 = vld [vmem:[#allocation13 + $0x144] sm:$0xf0]  ;;  %v4160_v1 = vld [vmem:[#allocation13 + $0x178] sm:$0xf0]  ;;  %v4681_v4 = vld [vmem:[#allocation13 + $0x24] sm:$0xf] }
 0x14c   : > { %v3984_v27 = vld [vmem:[#allocation13 + $0x18] sm:$0xf0]  ;;  %v4705_v25 = vld [vmem:[#allocation13 + $0xe4] sm:$0xf]  ;;  %v4088_v30 = vld [vmem:[#allocation13 + $0xe8] sm:$0xf0] }
 0x14d   : > { %v4091_v31 = vor.u32 %v4705_v25, %v4088_v30  ;;  %v4719_v32 = vld [vmem:[#allocation13 + $0x154] sm:$0xf]  ;;  %v4677_v37 = vld [vmem:[#allocation13 + $0x4] sm:$0xf]  ;;  %v4064_v8 = vld [vmem:[#allocation13 + $0xb8] sm:$0xf0] }
 0x14e   : > { %1890 = vmatpush.bf16.msrb.mxu2 %v4674_v35  ;;  %2250 = vmatpush.bf16.msrb.mxu3 %v4015_v7  ;;  %v4684_v35 = vld [vmem:[#allocation13 + $0x34] sm:$0xf0]  ;;  %v3992_v7 = vld [vmem:[#allocation13 + $0x28] sm:$0xf0]  ;;  %v4713_v9 = vld [vmem:[#allocation13 + $0x124] sm:$0xf] }
 0x14f   : > { %2265 = vmatpush.bf16.msra.mxu0 %v4071_v11  ;;  %v3999_v36 = vor.u32 %v4684_v35, %v3998_v34  ;;  %v3995_v11 = vor.u32 %v4681_v4, %v3992_v7  ;;  %v4102_v35 = vld [vmem:[#allocation13 + $0x100] sm:$0xf]  ;;  %v4288_v4 = vld [vmem:[#allocation14 + $0x108] sm:$0xf0]  ;;  %v4749_v16 = vld [vmem:[#allocation14 + $0xc4] sm:$0xf] }
 0x150   : > { %v4262_v14 = vld [vmem:[#allocation14 + $0xc0] sm:$0xf]  ;;  %v4112_v25 = vld [vmem:[#allocation13 + $0x118] sm:$0xf0] }
 0x152   : > { %1891 = vmatpush.bf16.msrb.mxu2 %v4673_v43  ;;  %1868 = vmatmul.bf16.vlgmr.msrb.gmra.mxu0 %v1650_v44  ;;  %v4135_v43 = vor.u32 %v4718_v41, %v4134_v10  ;;  %v4008_v44 = vld [vmem:[#allocation13 + $0x48] sm:$0xf0]  ;;  %v4334_v10 = vld [vmem:[#allocation14 + $0x150] sm:$0xf]  ;;  %v4770_v41 = vld [vmem:[#allocation14 + $0x164] sm:$0xf0] }
 0x153   : > { %1882 = vmatmul.bf16.vlgmr.msrb.gmra.mxu1 %v4556_v48  ;;  %2251 = vmatpush.bf16.msrb.mxu3 %v4007_v22  ;;  %v4011_v47 = vor.u32 %v4685_v42, %v4008_v44  ;;  %v3991_v48 = vor.u32 %v4682_v46, %v3990_v45  ;;  %v4712_v22 = vld [vmem:[#allocation13 + $0x114] sm:$0xf0]  ;;  %v4767_v44 = vld [vmem:[#allocation14 + $0x154] sm:$0xf]  ;;  %v4336_v45 = vld [vmem:[#allocation14 + $0x168] sm:$0xf0] }
 0x154   : > { %2266 = vmatpush.bf16.msra.mxu0 %v4063_v29  ;;  %2279 = vmatpush.bf16.msra.mxu1 %v4135_v43  ;;  %v3987_v29 = vor.u32 %v4679_v23, %v3984_v27  ;;  %v4335_v43 = vor.u32 %v4770_v41, %v4334_v10  ;;  %v4703_v46 = vld [vmem:[#allocation13 + $0xd4] sm:$0xf]  ;;  %v4953_v23 = vld [vmem:[#allocation10] ss:$0 sm:$0xff] }
 0x155   : > { %1602 = vmatmul.bf16.vlgmr.msra.gmra.mxu2 %v1146_v54  ;;  %1616 = vmatmul.bf16.vlgmr.msra.gmra.mxu3 %v1147_v55  ;;  %v4683_v54 = vld [vmem:[#allocation13 + $0x34] sm:$0xf]  ;;  %v4127_v55 = vor.u32 %v4716_v53, %v4126_v52  ;;  %v4310_v53 = vld [vmem:[#allocation14 + $0x120] sm:$0xf] }
 0x156   : > { %1892 = vmatpush.bf16.msrb.mxu2 %v4672_v51  ;;  %v4047_v51 = vor.u32 %v4696_v50, %v4046_v49  ;;  %v4003_v60 = vor.u32 %v4683_v54, %v4000_v57  ;;  %v4717_v49 = vld [vmem:[#allocation13 + $0x144] sm:$0xf]  ;;  %v4136_v50 = vld [vmem:[#allocation13 + $0x148] sm:$0xf0]  ;;  %v4764_v54 = vld [vmem:[#allocation14 + $0x134] sm:$0xf0] }
 0x157   : > { %2252 = vmatpush.bf16.msrb.mxu3 %v3999_v36  ;;  %v4710_v36 = vld [vmem:[#allocation13 + $0x104] sm:$0xf0]  ;;  %v4139_v52 = vor.u32 %v4717_v49, %v4136_v50  ;;  %v4311_v57 = vor.u32 %v4764_v54, %v4310_v53  ;;  %v4737_v49 = vld [vmem:[#allocation14 + $0x64] sm:$0xf]  ;;  %v4040_v53 = vld [vmem:[#allocation13 + $0x88] sm:$0xf0] }
 0x158   : > { %2267 = vmatpush.bf16.msra.mxu0 %v4055_v40  ;;  %2280 = vmatpush.bf16.msra.mxu1 %v4127_v55  ;;  %v4103_v6 = vor.u32 %v4710_v36, %v4102_v35  ;;  %v3976_v40 = vld [vmem:[#allocation13 + $0x8] sm:$0xf0]  ;;  %v4761_v55 = vld [vmem:[#allocation14 + $0x124] sm:$0xf]  ;;  %v4743_v35 = vld [vmem:[#allocation14 + $0x94] sm:$0xf] }
 0x159   : > { %v3979_v42 = vor.u32 %v4677_v37, %v3976_v40  ;;  %v4240_v37 = vld [vmem:[#allocation14 + $0xa8] sm:$0xf0]  ;;  %v4048_v40 = vld [vmem:[#allocation13 + $0x98] sm:$0xf0] }
 0x15a   : > { %1893 = vmatpush.bf16.msrb.mxu2 %v4671_v58  ;;  %v3982_v58 = vld [vmem:[#allocation13 + $0x10] sm:$0xf]  ;;  %v4243_v41 = vor.u32 %v4743_v35, %v4240_v37 }
 0x15b   : > { %2253 = vmatpush.bf16.msrb.mxu3 %v3991_v48  ;;  %v3983_v61 = vor.u32 %v4680_v59, %v3982_v58  ;;  %v4080_v48 = vld [vmem:[#allocation13 + $0xd8] sm:$0xf0]  ;;  %v4701_v59 = vld [vmem:[#allocation13 + $0xc4] sm:$0xf] }
 0x15c   : > { %2268 = vmatpush.bf16.msra.mxu0 %v4047_v51  ;;  %v4083_v51 = vor.u32 %v4703_v46, %v4080_v48  ;;  %v4312_v58 = vld [vmem:[#allocation14 + $0x138] sm:$0xf0]  ;;  %v4740_v48 = vld [vmem:[#allocation14 + $0x74] sm:$0xf0] }
 0x15e   : > { %1894 = vmatpush.bf16.msrb.mxu2 %v4670_v62  ;;  %v4038_v62 = vld [vmem:[#allocation13 + $0x80] sm:$0xf] }
 0x15f   : > { %v4039_v28 = vor.u32 %v4694_v63, %v4038_v62  ;;  %2254 = vmatpush.bf16.msrb.mxu3 %v3983_v61  ;;  %v4315_v61 = vor.u32 %v4761_v55, %v4312_v58  ;;  %v4715_v63 = vld [vmem:[#allocation13 + $0x134] sm:$0xf] }
 0x161   : > { %2269 = vmatpush.bf16.msra.mxu0 %v4039_v28  ;;  %v4128_v28 = vld [vmem:[#allocation13 + $0x138] sm:$0xf0] }
 0x162   : > { %1895 = vmatpush.bf16.msrb.mxu2 %v4669_v39  ;;  %v4163_v39 = vor.u32 %v4723_v0, %v4160_v1  ;;  %v4131_v0 = vor.u32 %v4715_v63, %v4128_v28  ;;  %v4286_v1 = vld [vmem:[#allocation14 + $0xf0] sm:$0xf]  ;;  %v4731_v63 = vld [vmem:[#allocation14 + $0x34] sm:$0xf] }
 0x163   : > { %2255 = vmatpush.bf16.msrb.mxu3 %v3975_v12 }
 0x165   : > { %1896 = vmatmul.bf16.vlgmr.msrb.gmra.mxu2 %v1662_v3  ;;  %v4714_v3 = vld [vmem:[#allocation13 + $0x124] sm:$0xf0]  ;;  %2318 = vmatpush.bf16.msrb.mxu0 %v4163_v39 }
 0x166   : > { %2290 = vmatpush.bf16.msra.mxu2 %v4035_v2  ;;  %v4118_v2 = vld [vmem:[#allocation13 + $0x120] sm:$0xf]  ;;  %v4758_v39 = vld [vmem:[#allocation14 + $0x104] sm:$0xf0] }
 0x167   : > { %v4119_v5 = vor.u32 %v4714_v3, %v4118_v2  ;;  %2304 = vmatpush.bf16.msra.mxu3 %v4099_v15  ;;  %v4755_v2 = vld [vmem:[#allocation14 + $0xf4] sm:$0xf]  ;;  %v4287_v3 = vor.u32 %v4758_v39, %v4286_v1  ;;  %v4752_v15 = vld [vmem:[#allocation14 + $0xd4] sm:$0xf0] }
 0x168   : > { %v4291_v7 = vor.u32 %v4755_v2, %v4288_v4  ;;  %v4263_v17 = vor.u32 %v4752_v15, %v4262_v14  ;;  %v4728_v4 = vld [vmem:[#allocation14 + $0x14] sm:$0xf0] }
 0x169   : > { %2281 = vmatpush.bf16.msra.mxu1 %v4119_v5  ;;  %2319 = vmatpush.bf16.msrb.mxu0 %v4155_v18  ;;  %v4699_v5 = vld [vmem:[#allocation13 + $0xb4] sm:$0xf]  ;;  %v4264_v18 = vld [vmem:[#allocation14 + $0xd8] sm:$0xf0] }
 0x16a   : > { %2291 = vmatpush.bf16.msra.mxu2 %v4027_v21  ;;  %v4110_v21 = vld [vmem:[#allocation13 + $0x110] sm:$0xf]  ;;  %v4067_v12 = vor.u32 %v4699_v5, %v4064_v8  ;;  %v4725_v5 = vld [vmem:[#allocation14 + $0x4] sm:$0xf] }
 0x16b   : > { %v4111_v26 = vor.u32 %v4712_v22, %v4110_v21  ;;  %2305 = vmatpush.bf16.msra.mxu3 %v4091_v31  ;;  %v4697_v21 = vld [vmem:[#allocation13 + $0xa4] sm:$0xf]  ;;  %v4056_v22 = vld [vmem:[#allocation13 + $0xa8] sm:$0xf0] }
 0x16c   : > { %v4059_v27 = vor.u32 %v4697_v21, %v4056_v22 }
 0x16d   : > { %2282 = vmatpush.bf16.msra.mxu1 %v4111_v26  ;;  %v4267_v26 = vor.u32 %v4749_v16, %v4264_v18 }
 0x16e   : > { %2292 = vmatpush.bf16.msra.mxu2 %v4019_v33  ;;  %v4144_v33 = vld [vmem:[#allocation13 + $0x158] sm:$0xf0] }
 0x16f   : > { %v4147_v34 = vor.u32 %v4719_v32, %v4144_v33  ;;  %2306 = vmatpush.bf16.msra.mxu3 %v4083_v51  ;;  %v4238_v33 = vld [vmem:[#allocation14 + $0x90] sm:$0xf]  ;;  %v4216_v51 = vld [vmem:[#allocation14 + $0x78] sm:$0xf0] }
 0x171   : > { %2320 = vmatpush.bf16.msrb.mxu0 %v4147_v34  ;;  %2283 = vmatpush.bf16.msra.mxu1 %v4103_v6  ;;  %v4746_v34 = vld [vmem:[#allocation14 + $0xa4] sm:$0xf0]  ;;  %v4695_v6 = vld [vmem:[#allocation13 + $0x94] sm:$0xf] }
 0x172   : > { %2293 = vmatpush.bf16.msra.mxu2 %v4011_v47  ;;  %v4339_v47 = vor.u32 %v4767_v44, %v4336_v45  ;;  %v4239_v36 = vor.u32 %v4746_v34, %v4238_v33  ;;  %v4104_v44 = vld [vmem:[#allocation13 + $0x108] sm:$0xf0]  ;;  %v4954_v33 = vld [vmem:[%s5811_s7] ss:$0 sm:$0xff] }
 0x175   : > { %2621 = vmatpush.bf16.msrb.mxu1 %v4335_v43  ;;  %2321 = vmatpush.bf16.msrb.mxu0 %v4139_v52  ;;  %v4709_v43 = vld [vmem:[#allocation13 + $0x104] sm:$0xf] }
 0x176   : > { %2294 = vmatpush.bf16.msra.mxu2 %v4003_v60  ;;  %v4072_v60 = vld [vmem:[#allocation13 + $0xc8] sm:$0xf0]  ;;  %v4107_v46 = vor.u32 %v4709_v43, %v4104_v44  ;;  %v4693_v52 = vld [vmem:[#allocation13 + $0x84] sm:$0xf]  ;;  %v4344_v43 = vld [vmem:[#allocation14 + $0x170] sm:$0xf0] }
 0x177   : > { %v4075_v62 = vor.u32 %v4701_v59, %v4072_v60  ;;  %v4043_v58 = vor.u32 %v4693_v52, %v4040_v53  ;;  %v4342_v52 = vld [vmem:[#allocation14 + $0x158] sm:$0xf] }
 0x179   : > { %2622 = vmatpush.bf16.msrb.mxu1 %v4311_v57  ;;  %2307 = vmatpush.bf16.msra.mxu3 %v4075_v62  ;;  %v4219_v57 = vor.u32 %v4737_v49, %v4216_v51  ;;  %v4734_v62 = vld [vmem:[#allocation14 + $0x44] sm:$0xf0] }
 0x17a   : > { %2295 = vmatpush.bf16.msra.mxu2 %v3995_v11  ;;  %2322 = vmatpush.bf16.msrb.mxu0 %v4131_v0  ;;  %v4120_v11 = vld [vmem:[#allocation13 + $0x128] sm:$0xf0] }
 0x17b   : > { %v4123_v13 = vor.u32 %v4713_v9, %v4120_v11  ;;  %v4192_v0 = vld [vmem:[#allocation14 + $0x48] sm:$0xf0]  ;;  %v4168_v9 = vld [vmem:[#allocation14 + $0x18] sm:$0xf0] }
 0x17c   : > { %v4195_v2 = vor.u32 %v4731_v63, %v4192_v0  ;;  %v4762_v0 = vld [vmem:[#allocation14 + $0x12c] sm:$0xf] }
 0x17d   : > { %2623 = vmatpush.bf16.msrb.mxu1 %v4287_v3  ;;  %2308 = vmatpush.bf16.msra.mxu3 %v4067_v12  ;;  %v4166_v3 = vld [vmem:[#allocation14] sm:$0xf] }
 0x17e   : > { %2296 = vmatpush.bf16.msra.mxu2 %v3987_v29  ;;  %2323 = vmatpush.bf16.msrb.mxu0 %v4123_v13  ;;  %v4711_v29 = vld [vmem:[#allocation13 + $0x114] sm:$0xf]  ;;  %v4167_v8 = vor.u32 %v4728_v4, %v4166_v3  ;;  %v4171_v13 = vor.u32 %v4725_v5, %v4168_v9  ;;  %v4350_v5 = vld [vmem:[#allocation14 + $0x160] sm:$0xf]  ;;  %v4318_v9 = vld [vmem:[#allocation14 + $0x128] sm:$0xf] }
 0x17f   : > { %v4115_v32 = vor.u32 %v4711_v29, %v4112_v25 }
 0x181   : > { %2624 = vmatpush.bf16.msrb.mxu1 %v4263_v17  ;;  %2309 = vmatpush.bf16.msra.mxu3 %v4059_v27 }
 0x182   : > { %2297 = vmatpush.bf16.msra.mxu2 %v3979_v42  ;;  %2324 = vmatpush.bf16.msrb.mxu0 %v4115_v32  ;;  %v4051_v42 = vor.u32 %v4695_v6, %v4048_v40 }
 0x185   : > { %2625 = vmatpush.bf16.msrb.mxu1 %v4239_v36  ;;  %2310 = vmatpush.bf16.msra.mxu3 %v4051_v42  ;;  %v4768_v42 = vld [vmem:[#allocation14 + $0x15c] sm:$0xf] }
 0x186   : > { %2634 = vmatpush.bf16.msrb.mxu2 %v4339_v47  ;;  %v4214_v47 = vld [vmem:[#allocation14 + $0x60] sm:$0xf]  ;;  %2325 = vmatpush.bf16.msrb.mxu0 %v4107_v46 }
 0x187   : > { %v4215_v50 = vor.u32 %v4740_v48, %v4214_v47 }
 0x189   : > { %2626 = vmatpush.bf16.msrb.mxu1 %v4215_v50  ;;  %2311 = vmatpush.bf16.msra.mxu3 %v4043_v58 }
 0x18a   : > { %2635 = vmatpush.bf16.msrb.mxu2 %v4315_v61  ;;  %v4190_v61 = vld [vmem:[#allocation14 + $0x30] sm:$0xf] }
 0x18b   : > { %v4191_v28 = vor.u32 %v4734_v62, %v4190_v61 }
 0x18d   : > { %2627 = vmatpush.bf16.msrb.mxu1 %v4191_v28 }
 0x18e   : > { %2636 = vmatpush.bf16.msrb.mxu2 %v4291_v7 }
 0x191   : > { %2628 = vmatpush.bf16.msrb.mxu1 %v4167_v8 }
 0x192   : > { %2637 = vmatpush.bf16.msrb.mxu2 %v4267_v26 }
 0x196   : > { %2638 = vmatpush.bf16.msrb.mxu2 %v4243_v41 }
 0x19a   : > { %2639 = vmatpush.bf16.msrb.mxu2 %v4219_v57  ;;  %v4771_v57 = vld [vmem:[#allocation14 + $0x16c] sm:$0xf0] }
 0x19b   : > { %v4343_v8 = vor.u32 %v4771_v57, %v4342_v52  ;;  %v4753_v52 = vld [vmem:[#allocation14 + $0xdc] sm:$0xf0] }
 0x19e   : > { %2640 = vmatpush.bf16.msrb.mxu2 %v4195_v2 }
 0x1a2   : > { %2641 = vmatpush.bf16.msrb.mxu2 %v4171_v13 }
 0x1bf   : > { %v1575_v45 = vpop.f32.mrf.mxu0  ;;  %v1589_v54 = vpop.f32.mrf.mxu1 }
 0x1c7   : > { %v1577_v7 = vpop.f32.mrf.mxu0  ;;  %v1591_v17 = vpop.f32.mrf.mxu1 }
 0x1c8   : > { %v1547_v30 = vpop.f32.mrf.mxu2  ;;  %v1561_v31 = vpop.f32.mrf.mxu3 }
 0x1c9   : > { %v1548_v10 = vadd.f32 %v4953_v23, %v1547_v30 }
 0x1cb   : > { %v1562_v55 = vadd.f32 %v1561_v31, %v1548_v10 }
 0x1cd   : > { %v1576_v1 = vadd.f32 %v1575_v45, %v1562_v55 }
 0x1cf   : > { %v1590_v12 = vadd.f32 %v1589_v54, %v1576_v1  ;;  %v4347_v54 = vor.u32 %v4768_v42, %v4344_v43  ;;  %v4320_v1 = vld [vmem:[#allocation14 + $0x140] sm:$0xf0]  ;;  %v4750_v42 = vld [vmem:[#allocation14 + $0xcc] sm:$0xf] }
 0x1d0   : > { %v1549_v59 = vpop.f32.mrf.mxu2  ;;  %v1563_v60 = vpop.f32.mrf.mxu3  ;;  %v4272_v43 = vld [vmem:[#allocation14 + $0xe0] sm:$0xf0] }
 0x1d1   : > { %v1550_v39 = vadd.f32 %v4953_v23, %v1549_v59  ;;  %v1869_v23 = vpop.f32.mrf.mxu0  ;;  %v1883_v31 = vpop.f32.mrf.mxu1  ;;  %v4769_v59 = vld [vmem:[#allocation14 + $0x164] sm:$0xf] }
 0x1d2   : > { %v1870_v6 = vadd.f32 %v4954_v33, %v1869_v23  ;;  %v4756_v23 = vld [vmem:[#allocation14 + $0xfc] sm:$0xf] }
 0x1d3   : > { %v1564_v11 = vadd.f32 %v1563_v60, %v1550_v39  ;;  %v4352_v60 = vld [vmem:[#allocation14 + $0x178] sm:$0xf0] }
 0x1d4   : > { %v1884_v61 = vadd.f32 %v1883_v31, %v1870_v6  ;;  %v4766_v31 = vld [vmem:[#allocation14 + $0x144] sm:$0xf0]  ;;  %v4757_v6 = vld [vmem:[#allocation14 + $0x104] sm:$0xf] }
 0x1d5   : > { %v1578_v18 = vadd.f32 %v1577_v7, %v1564_v11  ;;  %v4772_v7 = vld [vmem:[#allocation14 + $0x174] sm:$0xf0]  ;;  %v4355_v11 = vor.u32 %v4769_v59, %v4352_v60  ;;  %v4280_v59 = vld [vmem:[#allocation14 + $0xe8] sm:$0xf0]  ;;  %v4278_v60 = vld [vmem:[#allocation14 + $0xd0] sm:$0xf] }
 0x1d7   : > { %v1592_v27 = vadd.f32 %v1591_v17, %v1578_v18  ;;  %v4763_v17 = vld [vmem:[#allocation14 + $0x134] sm:$0xf]  ;;  %v4328_v18 = vld [vmem:[#allocation14 + $0x148] sm:$0xf0] }
 0x1d8   : > { %v1603_v14 = vpop.f32.mrf.mxu2  ;;  %v1617_v15 = vpop.f32.mrf.mxu3 }
 0x1d9   : > { %v1604_v16 = vadd.f32 %v1603_v14, %v1590_v12  ;;  %v1871_v45 = vpop.f32.mrf.mxu0  ;;  %v1885_v39 = vpop.f32.mrf.mxu1 }
 0x1da   : > { %v1872_v62 = vadd.f32 %v4954_v33, %v1871_v45  ;;  %v4302_v45 = vld [vmem:[#allocation14 + $0x100] sm:$0xf] }
 0x1db   : > { %v1618_v21 = vadd.f32 %v1617_v15, %v1604_v16  ;;  %v4323_v15 = vor.u32 %v4762_v0, %v4320_v1  ;;  %v4765_v16 = vld [vmem:[#allocation14 + $0x13c] sm:$0xf0]  ;;  %v4246_v0 = vld [vmem:[#allocation14 + $0x98] sm:$0xf] }
 0x1dc   : > { %v4319_v33 = vor.u32 %v4765_v16, %v4318_v9  ;;  %v4256_v9 = vld [vmem:[#allocation14 + $0xb8] sm:$0xf0] }
 0x1dd   : > { %v1622_v22 = vmax.f32 %v1618_v21, 0.0  ;;  %v1886_v21 = vadd.f32 %v1885_v39, %v1872_v62  ;;  %v4747_v39 = vld [vmem:[#allocation14 + $0xac] sm:$0xf0] }
 0x1df   : > { %v1914_v26 = vrot.slane %v1622_v22, 7  ;;  %v1932_v36 = vpack.c.bf16 %v1622_v22, %v1622_v22  ;;  %v1922_v44 = vrot.slane %v1622_v22, 1 }
 0x1e0   : > { %v1605_v29 = vpop.f32.mrf.mxu2  ;;  %v1619_v32 = vpop.f32.mrf.mxu3 }
 0x1e1   : > { %v1919_v25 = vsel %vm656_vm3, %v1622_v22, %v1914_v26  ;;  %v1606_v30 = vadd.f32 %v1605_v29, %v1592_v27  ;;  %v1944_v49 = vunpack.c.l.b16 %v1932_v36  ;;  %v4351_v27 = vor.u32 %v4772_v7, %v4350_v5 }
 0x1e2   : > { %v1920_v35 = vmul.f32 %v5619_v20, %v1919_v25 }
 0x1e3   : > { %v1620_v34 = vadd.f32 %v1619_v32, %v1606_v30  ;;  %v4326_v30 = vld [vmem:[#allocation14 + $0x130] sm:$0xf] }
 0x1e4   : > { %v1930_v47 = vpack.c.bf16 %v1920_v35, %v1920_v35  ;;  %v4331_v35 = vor.u32 %v4763_v17, %v4328_v18  ;;  %v4741_v17 = vld [vmem:[#allocation14 + $0x7c] sm:$0xf0]  ;;  %v4732_v18 = vld [vmem:[#allocation14 + $0x3c] sm:$0xf] }
 0x1e5   : > { %v1623_v37 = vmax.f32 %v1620_v34, 0.0  ;;  %v4294_v34 = vld [vmem:[#allocation14 + $0xf8] sm:$0xf] }
 0x1e6   : > { %v1938_v2 = vunpack.c.l.b16 %v1930_v47 }
 0x1e7   : > { %v1915_v40 = vrot.slane %v1623_v37, 7  ;;  %v1923_v10 = vrot.slane %v1623_v37, 1  ;;  %v1933_v41 = vpack.c.bf16 %v1623_v37, %v1623_v37 }
 0x1e8   : > { %v1897_v46 = vpop.f32.mrf.mxu2 }
 0x1e9   : > { %v1927_v48 = vsel %vm665_vm0, %v1923_v10, %v1623_v37  ;;  %v1945_v50 = vunpack.c.l.b16 %v1933_v41  ;;  %v1916_v51 = vsel %vm656_vm3, %v1914_v26, %v1915_v40  ;;  %v1924_v58 = vsel %vm665_vm0, %v1922_v44, %v1923_v10  ;;  %v4296_v26 = vld [vmem:[#allocation14 + $0x110] sm:$0xf0]  ;;  %v4759_v37 = vld [vmem:[#allocation14 + $0x10c] sm:$0xf0]  ;;  %v4304_v40 = vld [vmem:[#allocation14 + $0x118] sm:$0xf0] }
 0x1ea   : > { %v1929_v53 = vmul.f32 %v5624_v24, %v1927_v48  ;;  %v1931_v55 = vpack.c.bf16 %v1916_v51, %v1916_v51  ;;  %v1934_v28 = vpack.c.bf16 %v1924_v58, %v1924_v58  ;;  %v1898_v22 = vadd.f32 %v1897_v46, %v1884_v61  ;;  %v4760_v46 = vld [vmem:[#allocation14 + $0x114] sm:$0xf0]  ;;  %v4751_v58 = vld [vmem:[#allocation14 + $0xd4] sm:$0xf]  ;;  %v4754_v61 = vld [vmem:[#allocation14 + $0xe4] sm:$0xf0] }
 0x1eb   : > { %v5711_v63 = vpack.c.b16 %v1945_v50, %v1944_v49  ;;  %v4299_v36 = vor.u32 %v4756_v23, %v4296_v26  ;;  %v4327_v44 = vor.u32 %v4766_v31, %v4326_v30  ;;  %v4295_v48 = vor.u32 %v4759_v37, %v4294_v34  ;;  %v4270_v49 = vld [vmem:[#allocation14 + $0xc8] sm:$0xf]  ;;  %v4198_v31 = vld [vmem:[#allocation14 + $0x38] sm:$0xf]  ;;  %v4176_v37 = vld [vmem:[#allocation14 + $0x20] sm:$0xf0] }
 0x1ec   : > { %v1939_v3 = vunpack.c.l.b16 %v1931_v55  ;;  %v1935_v4 = vpack.c.bf16 %v1929_v53, %v1929_v53  ;;  %v1950_v13 = vunpack.c.l.b16 %v1934_v28  ;;  %v1902_v10 = vmax.f32 %v1898_v22, 0.0  ;;  %v4744_v53 = vld [vmem:[#allocation14 + $0x9c] sm:$0xf] }
 0x1ed   : > { %2270 = vmatmul.bf16.vlgmr.msra.gmra.mxu0 %v5711_v63  ;;  %v4307_v50 = vor.u32 %v4757_v6, %v4304_v40  ;;  %v4275_v51 = vor.u32 %v4750_v42, %v4272_v43  ;;  %v4303_v57 = vor.u32 %v4760_v46, %v4302_v45  ;;  %v4271_v28 = vor.u32 %v4753_v52, %v4270_v49  ;;  %v4736_v45 = vld [vmem:[#allocation14 + $0x54] sm:$0xf0] }
 0x1ee   : > { %2660 = vmatpush.bf16.msra.mxu0 %v4347_v54  ;;  %v1940_v12 = vpack.c.b16 %v1939_v3, %v1938_v2  ;;  %v1951_v14 = vunpack.c.l.b16 %v1935_v4  ;;  %v4248_v54 = vld [vmem:[#allocation14 + $0xb0] sm:$0xf0]  ;;  %v4738_v2 = vld [vmem:[#allocation14 + $0x6c] sm:$0xf]  ;;  %v4224_v3 = vld [vmem:[#allocation14 + $0x80] sm:$0xf0]  ;;  %v4283_v4 = vor.u32 %v4751_v58, %v4280_v59  ;;  %v4279_v7 = vor.u32 %v4754_v61, %v4278_v60 }
 0x1ef   : > { %v4251_v1 = vor.u32 %v4744_v53, %v4248_v54  ;;  %v4227_v16 = vor.u32 %v4738_v2, %v4224_v3  ;;  %v4182_v54 = vld [vmem:[#allocation14 + $0x10] sm:$0xf]  ;;  %v4780_v59 = vld [vmem:[#allocation16 + $0x38] sm:$0xff]  ;;  %v4777_v3 = vld [vmem:[#allocation16 + $0x20] sm:$0xff] }
 0x1f0   : > { %v1899_v29 = vpop.f32.mrf.mxu2  ;;  %2256 = vmatmul.bf16.vlgmr.msrb.gmra.mxu3 %v1940_v12  ;;  %2298 = vmatmul.bf16.vlgmr.msra.gmra.mxu2 %v1940_v12  ;;  %v1952_v25 = vpack.c.b16 %v1951_v14, %v1950_v13  ;;  %v4748_v12 = vld [vmem:[#allocation14 + $0xb4] sm:$0xf0]  ;;  %v4247_v14 = vor.u32 %v4747_v39, %v4246_v0  ;;  %v4779_v61 = vld [vmem:[#allocation16 + $0x30] sm:$0xff]  ;;  %v4778_v0 = vld [vmem:[#allocation16 + $0x28] sm:$0xff] }
 0x1f1   : > { %v1900_v32 = vadd.f32 %v1899_v29, %v1886_v21  ;;  %2647 = vmatpush.bf16.msrb.mxu3 %v4343_v8  ;;  %2686 = vmatpush.bf16.msra.mxu2 %v4355_v11  ;;  %v4745_v8 = vld [vmem:[#allocation14 + $0xa4] sm:$0xf]  ;;  %v4254_v11 = vld [vmem:[#allocation14 + $0xa0] sm:$0xf]  ;;  %v4200_v21 = vld [vmem:[#allocation14 + $0x50] sm:$0xf0] }
 0x1f2   : > { %2284 = vmatmul.bf16.vlgmr.msra.gmra.mxu1 %v1952_v25  ;;  %2661 = vmatpush.bf16.msra.mxu0 %v4323_v15  ;;  %v4222_v15 = vld [vmem:[#allocation14 + $0x68] sm:$0xf]  ;;  %v4259_v22 = vor.u32 %v4745_v8, %v4256_v9  ;;  %v4255_v26 = vor.u32 %v4748_v12, %v4254_v11  ;;  %v4232_v29 = vld [vmem:[#allocation14 + $0x88] sm:$0xf0]  ;;  %v4203_v34 = vor.u32 %v4732_v18, %v4200_v21  ;;  %v4788_v60 = vld [vmem:[#allocation16 + $0x78] sm:$0xff] }
 0x1f3   : > { %v1903_v41 = vmax.f32 %v1900_v32, 0.0  ;;  %2673 = vmatpush.bf16.msra.mxu1 %v4351_v27  ;;  %v4739_v27 = vld [vmem:[#allocation14 + $0x74] sm:$0xf]  ;;  %v4230_v32 = vld [vmem:[#allocation14 + $0x70] sm:$0xf]  ;;  %v4796_v39 = vld [vmem:[#allocation16 + $0xb8] sm:$0xff] }
 0x1f4   : > { %v4235_v6 = vor.u32 %v4739_v27, %v4232_v29  ;;  %v4804_v2 = vld [vmem:[#allocation16 + $0xf8] sm:$0xff]  ;;  %v4793_v18 = vld [vmem:[#allocation16 + $0xa0] sm:$0xff]  ;;  %v4774_v27 = vld [vmem:[#allocation16 + $0x8] sm:$0xff] }
 0x1f5   : > { %v1904_v47 = vadd.f32 %v1903_v41, %v1902_v10  ;;  %2648 = vmatpush.bf16.msrb.mxu3 %v4319_v33  ;;  %2687 = vmatpush.bf16.msra.mxu2 %v4331_v35  ;;  %v4742_v33 = vld [vmem:[#allocation14 + $0x84] sm:$0xf0]  ;;  %v4735_v35 = vld [vmem:[#allocation14 + $0x4c] sm:$0xf0]  ;;  %v4733_v10 = vld [vmem:[#allocation14 + $0x44] sm:$0xf] }
 0x1f6   : > { %2662 = vmatpush.bf16.msra.mxu0 %v4299_v36  ;;  %v4726_v36 = vld [vmem:[#allocation14 + $0xc] sm:$0xf]  ;;  %v4208_v41 = vld [vmem:[#allocation14 + $0x58] sm:$0xf0]  ;;  %v4231_v42 = vor.u32 %v4742_v33, %v4230_v32  ;;  %v4773_v32 = vld [vmem:[#allocation16] sm:$0xff] }
 0x1f7   : > { %v1905_v55 = vrot.slane %v1904_v47, 4  ;;  %2674 = vmatpush.bf16.msra.mxu1 %v4327_v44  ;;  %v4206_v44 = vld [vmem:[#allocation14 + $0x40] sm:$0xf]  ;;  %v4179_v46 = vor.u32 %v4726_v36, %v4176_v37  ;;  %v4211_v49 = vor.u32 %v4733_v10, %v4208_v41  ;;  %v4776_v12 = vld [vmem:[#allocation16 + $0x18] sm:$0xff]  ;;  %v4782_v29 = vld [vmem:[#allocation16 + $0x48] sm:$0xff] }
 0x1f8   : > { %v4207_v52 = vor.u32 %v4736_v45, %v4206_v44  ;;  %v4781_v33 = vld [vmem:[#allocation16 + $0x40] sm:$0xff]  ;;  %v4812_v36 = vld [vmem:[#allocation16 + $0x138] sm:$0xff]  ;;  %v4790_v41 = vld [vmem:[#allocation16 + $0x88] sm:$0xff] }
 0x1f9   : > { %v1906_v62 = vadd.f32 %v1905_v55, %v1904_v47  ;;  %2649 = vmatpush.bf16.msrb.mxu3 %v4295_v48  ;;  %2688 = vmatpush.bf16.msra.mxu2 %v4307_v50  ;;  %v4174_v47 = vld [vmem:[#allocation14 + $0x8] sm:$0xf]  ;;  %v4729_v48 = vld [vmem:[#allocation14 + $0x1c] sm:$0xf0]  ;;  %v4727_v50 = vld [vmem:[#allocation14 + $0x14] sm:$0xf] }
 0x1fa   : > { %2663 = vmatpush.bf16.msra.mxu0 %v4275_v51  ;;  %v4184_v51 = vld [vmem:[#allocation14 + $0x28] sm:$0xf0]  ;;  %v4175_v53 = vor.u32 %v4729_v48, %v4174_v47  ;;  %v4730_v55 = vld [vmem:[#allocation14 + $0x24] sm:$0xf0]  ;;  %v4820_v37 = vld [vmem:[#allocation16 + $0x178] sm:$0xff] }
 0x1fb   : > { %v1907_v5 = vrot.slane %v1906_v62, 2  ;;  %2675 = vmatpush.bf16.msra.mxu1 %v4303_v57  ;;  %v4187_v57 = vor.u32 %v4727_v50, %v4184_v51  ;;  %v4183_v58 = vor.u32 %v4730_v55, %v4182_v54  ;;  %v4819_v44 = vld [vmem:[#allocation16 + $0x170] sm:$0xff]  ;;  %v4789_v45 = vld [vmem:[#allocation16 + $0x80] sm:$0xff]  ;;  %v4810_v47 = vld [vmem:[#allocation16 + $0x128] sm:$0xff] }
 0x1fc   : > { %v4818_v48 = vld [vmem:[#allocation16 + $0x168] sm:$0xff]  ;;  %v4809_v54 = vld [vmem:[#allocation16 + $0x120] sm:$0xff] }
 0x1fd   : > { %v1908_v13 = vadd.f32 %v1907_v5, %v1906_v62  ;;  %2326 = vmatmul.bf16.vlgmr.msrb.gmra.mxu0 %v1952_v25  ;;  %2650 = vmatpush.bf16.msrb.mxu3 %v4271_v28  ;;  %v4223_v25 = vor.u32 %v4741_v17, %v4222_v15  ;;  %v4787_v62 = vld [vmem:[#allocation16 + $0x70] sm:$0xff]  ;;  %v4802_v15 = vld [vmem:[#allocation16 + $0xe8] sm:$0xff]  ;;  %v4817_v55 = vld [vmem:[#allocation16 + $0x160] sm:$0xff] }
 0x1fe   : > { %2664 = vmatpush.bf16.msra.mxu0 %v4251_v1  ;;  %2689 = vmatpush.bf16.msra.mxu2 %v4283_v4  ;;  %v4786_v1 = vld [vmem:[#allocation16 + $0x68] sm:$0xff]  ;;  %v4785_v4 = vld [vmem:[#allocation16 + $0x60] sm:$0xff]  ;;  %v4795_v5 = vld [vmem:[#allocation16 + $0xb0] sm:$0xff] }
 0x1ff   : > { %v1909_v23 = vrot.slane %v1908_v13, 1  ;;  %2676 = vmatpush.bf16.msra.mxu1 %v4279_v7  ;;  %v4803_v7 = vld [vmem:[#allocation16 + $0xf0] sm:$0xff] }
 0x200   : > { %2312 = vmatmul.bf16.vlgmr.msra.gmra.mxu3 %v5711_v63  ;;  %v4199_v63 = vor.u32 %v4735_v35, %v4198_v31  ;;  %v4783_v17 = vld [vmem:[#allocation16 + $0x50] sm:$0xff]  ;;  %v4800_v31 = vld [vmem:[#allocation16 + $0xd8] sm:$0xff] }
 0x201   : > { %v1910_v30 = vadd.f32 %v1909_v23, %v1908_v13  ;;  %2651 = vmatpush.bf16.msrb.mxu3 %v4247_v14  ;;  %v4784_v13 = vld [vmem:[#allocation16 + $0x58] sm:$0xff]  ;;  %v4794_v14 = vld [vmem:[#allocation16 + $0xa8] sm:$0xff]  ;;  %v4799_v35 = vld [vmem:[#allocation16 + $0xd0] sm:$0xff] }
 0x202   : > { %2665 = vmatpush.bf16.msra.mxu0 %v4227_v16  ;;  %2690 = vmatpush.bf16.msra.mxu2 %v4259_v22  ;;  %v4775_v16 = vld [vmem:[#allocation16 + $0x10] sm:$0xff]  ;;  %v4801_v22 = vld [vmem:[#allocation16 + $0xe0] sm:$0xff] }
 0x203   : > { %v1911_v40 = vmul.f32 0.0625, %v1910_v30  ;;  %2677 = vmatpush.bf16.msra.mxu1 %v4255_v26  ;;  %v4792_v30 = vld [vmem:[#allocation16 + $0x98] sm:$0xff] }
 0x205   : > { %v2332_v43 = vpack.c.bf16 %v1911_v40, %v1911_v40  ;;  %2652 = vmatpush.bf16.msrb.mxu3 %v4223_v25 }
 0x206   : > { %2666 = vmatpush.bf16.msra.mxu0 %v4203_v34  ;;  %2691 = vmatpush.bf16.msra.mxu2 %v4235_v6  ;;  %v4791_v34 = vld [vmem:[#allocation16 + $0x90] sm:$0xff] }
 0x207   : > { %2629 = vmatmul.bf16.vlgmr.msrb.gmra.mxu1 %v2332_v43  ;;  %2642 = vmatmul.bf16.vlgmr.msrb.gmra.mxu2 %v2332_v43 }
 0x208   : > { %2678 = vmatpush.bf16.msra.mxu1 %v4231_v42  ;;  %v4798_v42 = vld [vmem:[#allocation16 + $0xc8] sm:$0xff] }
 0x209   : > { %2653 = vmatpush.bf16.msrb.mxu3 %v4199_v63  ;;  %v4811_v63 = vld [vmem:[#allocation16 + $0x130] sm:$0xff] }
 0x20a   : > { %2667 = vmatpush.bf16.msra.mxu0 %v4179_v46  ;;  %2692 = vmatpush.bf16.msra.mxu2 %v4211_v49  ;;  %v4797_v46 = vld [vmem:[#allocation16 + $0xc0] sm:$0xff]  ;;  %v2002_v49 = vld [vmem:[%s5853_s5] sm:$0x3] }
 0x20c   : > { %2679 = vmatpush.bf16.msra.mxu1 %v4207_v52 }
 0x20d   : > { %2654 = vmatpush.bf16.msrb.mxu3 %v4175_v53  ;;  %2668 = vmatmul.bf16.vlgmr.msra.gmra.mxu0 %v2332_v43 }
 0x20e   : > { %2693 = vmatpush.bf16.msra.mxu2 %v4187_v57  ;;  %3203 = vmatpush.bf16.msrb.mxu0 %v4788_v60  ;;  %v2004_v57 = vperm.slane %v2002_v49, 0 }
 0x210   : > { %2655 = vmatmul.bf16.vlgmr.msrb.gmra.mxu3 %v2332_v43  ;;  %2680 = vmatpush.bf16.msra.mxu1 %v4183_v58  ;;  %v4808_v58 = vld [vmem:[#allocation16 + $0x118] sm:$0xff] }
 0x211   : > { %3189 = vmatpush.bf16.msra.mxu3 %v4780_v59  ;;  %v4816_v59 = vld [vmem:[#allocation16 + $0x158] sm:$0xff] }
 0x212   : > { %3204 = vmatpush.bf16.msrb.mxu0 %v4787_v62  ;;  %3231 = vmatpush.bf16.msrb.mxu2 %v4804_v2  ;;  %v4815_v2 = vld [vmem:[#allocation16 + $0x150] sm:$0xff] }
 0x214   : > { %3217 = vmatpush.bf16.msrb.mxu1 %v4796_v39  ;;  %v4807_v39 = vld [vmem:[#allocation16 + $0x110] sm:$0xff] }
 0x215   : > { %3190 = vmatpush.bf16.msra.mxu3 %v4779_v61 }
 0x216   : > { %3205 = vmatpush.bf16.msrb.mxu0 %v4786_v1  ;;  %3232 = vmatpush.bf16.msrb.mxu2 %v4803_v7 }
 0x217   : > { %2681 = vmatmul.bf16.vlgmr.msra.gmra.mxu1 %v2332_v43  ;;  %2694 = vmatmul.bf16.vlgmr.msra.gmra.mxu2 %v2332_v43 }
 0x218   : > { %3218 = vmatpush.bf16.msrb.mxu1 %v4795_v5  ;;  %v3483_v5 = vsel %vm641_vm4, 1.0, %v5327_v19 }
 0x219   : > { %3191 = vmatpush.bf16.msra.mxu3 %v4778_v0 }
 0x21a   : > { %3206 = vmatpush.bf16.msrb.mxu0 %v4785_v4  ;;  %3233 = vmatpush.bf16.msrb.mxu2 %v4802_v15 }
 0x21c   : > { %3219 = vmatpush.bf16.msrb.mxu1 %v4794_v14 }
 0x21d   : > { %3192 = vmatpush.bf16.msra.mxu3 %v4777_v3  ;;  %v2005_v3 = vperm.slane %v2002_v49, 1 }
 0x21e   : > { %3207 = vmatpush.bf16.msrb.mxu0 %v4784_v13  ;;  %3234 = vmatpush.bf16.msrb.mxu2 %v4801_v22  ;;  %v4806_v22 = vld [vmem:[#allocation16 + $0x108] sm:$0xff] }
 0x220   : > { %3220 = vmatpush.bf16.msrb.mxu1 %v4793_v18 }
 0x221   : > { %3193 = vmatpush.bf16.msra.mxu3 %v4776_v12 }
 0x222   : > { %3208 = vmatpush.bf16.msrb.mxu0 %v4783_v17  ;;  %3235 = vmatpush.bf16.msrb.mxu2 %v4800_v31 }
 0x224   : > { %3221 = vmatpush.bf16.msrb.mxu1 %v4792_v30 }
 0x225   : > { %3194 = vmatpush.bf16.msra.mxu3 %v4775_v16 }
 0x226   : > { %3209 = vmatpush.bf16.msrb.mxu0 %v4782_v29  ;;  %3236 = vmatpush.bf16.msrb.mxu2 %v4799_v35 }
 0x228   : > { %3222 = vmatpush.bf16.msrb.mxu1 %v4791_v34 }
 0x229   : > { %3195 = vmatpush.bf16.msra.mxu3 %v4774_v27 }
 0x22a   : > { %3210 = vmatpush.bf16.msrb.mxu0 %v4781_v33  ;;  %3237 = vmatpush.bf16.msrb.mxu2 %v4798_v42 }
 0x22c   : > { %3223 = vmatpush.bf16.msrb.mxu1 %v4790_v41 }
 0x22d   : > { %3196 = vmatpush.bf16.msra.mxu3 %v4773_v32 }
 0x22e   : > { %3259 = vmatpush.bf16.msra.mxu0 %v4820_v37  ;;  %3238 = vmatpush.bf16.msrb.mxu2 %v4797_v46 }
 0x230   : > { %3224 = vmatpush.bf16.msrb.mxu1 %v4789_v45 }
 0x231   : > { %3245 = vmatpush.bf16.msrb.mxu3 %v4812_v36 }
 0x232   : > { %3260 = vmatpush.bf16.msra.mxu0 %v4819_v44 }
 0x235   : > { %3246 = vmatpush.bf16.msrb.mxu3 %v4811_v63 }
 0x236   : > { %3261 = vmatpush.bf16.msra.mxu0 %v4818_v48 }
 0x239   : > { %3247 = vmatpush.bf16.msrb.mxu3 %v4810_v47 }
 0x23a   : > { %3262 = vmatpush.bf16.msra.mxu0 %v4817_v55 }
 0x23d   : > { %3248 = vmatpush.bf16.msrb.mxu3 %v4809_v54 }
 0x23e   : > { %3263 = vmatpush.bf16.msra.mxu0 %v4816_v59 }
 0x241   : > { %3249 = vmatpush.bf16.msrb.mxu3 %v4808_v58 }
 0x242   : > { %3264 = vmatpush.bf16.msra.mxu0 %v4815_v2 }
 0x245   : > { %3250 = vmatpush.bf16.msrb.mxu3 %v4807_v39 }
 0x249   : > { %3251 = vmatpush.bf16.msrb.mxu3 %v4806_v22 }
 0x26a   : > { %v5715_v28 = vpop.f32.mrf.mxu0 }
 0x26f   : > { %v5717_v8 = vpop.f32.mrf.mxu1 }
 0x272   : > { %v5719_v9 = vpop.f32.mrf.mxu0 }
 0x273   : > { %v5721_v11 = vpop.f32.mrf.mxu3  ;;  %v5723_v21 = vpop.f32.mrf.mxu2 }
 0x274   : > { %v2258_v60 = vadd.f32 %v5721_v11, %v2004_v57  ;;  %v3482_v11 = vsel %vm634_vm5, 1.0, %v5327_v19  ;;  %v2300_v27 = vadd.f32 %v5723_v21, %v2005_v3 }
 0x276   : > { %v2272_v12 = vadd.f32 %v5715_v28, %v2258_v60 }
 0x277   : > { %v5727_v25 = vpop.f32.mrf.mxu1 }
 0x278   : > { %v2286_v28 = vadd.f32 %v5717_v8, %v2272_v12  ;;  %v4813_v8 = vld [vmem:[#allocation16 + $0x140] sm:$0xff] }
 0x27a   : > { %v5725_v23 = vpop.f32.mrf.mxu0 }
 0x27b   : > { %v2259_v26 = vpop.f32.mrf.mxu3  ;;  %v5729_v6 = vpop.f32.mrf.mxu2 }
 0x27c   : > { %v2260_v61 = vadd.f32 %v2259_v26, %v2004_v57  ;;  %v4814_v26 = vld [vmem:[#allocation16 + $0x148] sm:$0xff]  ;;  %v2302_v19 = vadd.f32 %v5729_v6, %v2005_v3 }
 0x27d   : > { %3265 = vmatpush.bf16.msra.mxu0 %v4814_v26 }
 0x27e   : > { %v2274_v38 = vadd.f32 %v5719_v9, %v2260_v61 }
 0x280   : > { %v2288_v9 = vadd.f32 %v5727_v25, %v2274_v38 }
 0x281   : > { %3266 = vmatpush.bf16.msra.mxu0 %v4813_v8 }
 0x282   : > { %v5731_v40 = vpop.f32.mrf.mxu0 }
 0x283   : > { %v5733_v10 = vpop.f32.mrf.mxu3 }
 0x284   : > { %v2630_v43 = vpop.f32.mrf.mxu1  ;;  %v2314_v33 = vadd.f32 %v5733_v10, %v2300_v27 }
 0x285   : > { %v2705_v14 = vperm.slane %v2630_v43, 0  ;;  %v4805_v43 = vld [vmem:[#allocation16 + $0x100] sm:$0xff] }
 0x286   : > { %v2328_v10 = vadd.f32 %v5725_v23, %v2314_v33  ;;  %3252 = vmatpush.bf16.msrb.mxu3 %v4805_v43 }
 0x28a   : > { %v5738_v50 = vpop.f32.mrf.mxu2  ;;  %v2669_v51 = vpop.f32.mrf.mxu0 }
 0x28b   : > { %v2315_v52 = vpop.f32.mrf.mxu3  ;;  %v2700_v56 = vperm.slane %v2669_v51, 0  ;;  %v2706_v37 = vperm.slane %v5738_v50, 0 }
 0x28c   : > { %v2632_v53 = vpop.f32.mrf.mxu1  ;;  %v2316_v41 = vadd.f32 %v2315_v52, %v2302_v19 }
 0x28d   : > { %v2702_v31 = vmul.f32 %v3482_v11, %v2700_v56  ;;  %v2704_v32 = vmul.f32 0.0, %v2700_v56 }
 0x28e   : > { %v2330_v49 = vadd.f32 %v5731_v40, %v2316_v41 }
 0x28f   : > { %v2708_v45 = vsub.f32 %v2706_v37, %v2702_v31  ;;  %v2710_v46 = vsub.f32 %v2706_v37, %v2704_v32 }
 0x292   : > { %v2645_v62 = vpop.f32.mrf.mxu2  ;;  %v2671_v0 = vpop.f32.mrf.mxu0 }
 0x293   : > { %v2656_v1 = vpop.f32.mrf.mxu3 }
 0x294   : > { %v2699_v4 = vperm.slane %v2656_v1, 0  ;;  %v2682_v7 = vpop.f32.mrf.mxu1 }
 0x295   : > { %v2711_v13 = vperm.slane %v2682_v7, 0 }
 0x296   : > { %v2701_v15 = vmul.f32 %v3482_v11, %v2699_v4  ;;  %v2703_v16 = vmul.f32 0.0, %v2699_v4 }
 0x297   : > { %v2713_v17 = vmul.f32 0.0, %v2711_v13  ;;  %v2715_v18 = vmul.f32 %v3483_v5, %v2711_v13 }
 0x298   : > { %v2707_v29 = vsub.f32 %v2705_v14, %v2701_v15  ;;  %v2709_v30 = vsub.f32 %v2705_v14, %v2703_v16 }
 0x29a   : > { %v2717_v34 = vsub.f32 %v2707_v29, %v2713_v17  ;;  %v2719_v35 = vsub.f32 %v2709_v30, %v2715_v18  ;;  %v2695_v36 = vpop.f32.mrf.mxu2 }
 0x29b   : > { %v2712_v42 = vperm.slane %v2695_v36, 0  ;;  %v2658_v21 = vpop.f32.mrf.mxu3 }
 0x29c   : > { %v2721_v63 = vadd.f32 %v2717_v34, %v2286_v28  ;;  %v2723_v6 = vadd.f32 %v2719_v35, %v2288_v9  ;;  %v2684_v44 = vpop.f32.mrf.mxu1 }
 0x29d   : > { %v2714_v25 = vmul.f32 0.0, %v2712_v42  ;;  %v2716_v47 = vmul.f32 %v3483_v5, %v2712_v42 }
 0x29e   : > { %v2725_v48 = vmax.f32 %v2721_v63, 0.0  ;;  %v2727_v50 = vmax.f32 %v2723_v6, 0.0 }
 0x29f   : > { %v2718_v51 = vsub.f32 %v2708_v45, %v2714_v25  ;;  %v2720_v52 = vsub.f32 %v2710_v46, %v2716_v47 }
 0x2a0   : > { %v2733_v55 = vrot.slane %v2725_v48, 7  ;;  %v2735_v58 = vrot.slane %v2727_v50, 7  ;;  %v2750_v26 = vrot.slane %v2727_v50, 1  ;;  %v2749_v31 = vrot.slane %v2725_v48, 1 }
 0x2a1   : > { %v2722_v53 = vadd.f32 %v2718_v51, %v2328_v10  ;;  %v2724_v54 = vadd.f32 %v2720_v52, %v2330_v49 }
 0x2a2   : > { %v2697_v57 = vpop.f32.mrf.mxu2  ;;  %v2743_v23 = vsel %vm656_vm3, %v2725_v48, %v2733_v55  ;;  %v2736_v40 = vsel %vm656_vm3, %v2733_v55, %v2735_v58  ;;  %v2751_v34 = vsel %vm665_vm0, %v2749_v31, %v2750_v26 }
 0x2a3   : > { %v2726_v59 = vmax.f32 %v2722_v53, 0.0  ;;  %v2728_v60 = vmax.f32 %v2724_v54, 0.0  ;;  %v2745_v12 = vmul.f32 %v5619_v20, %v2743_v23 }
 0x2a5   : > { %v2734_v61 = vrot.slane %v2726_v59, 7  ;;  %v2737_v62 = vrot.slane %v2728_v60, 7  ;;  %v2767_v0 = vpack.c.bf16 %v2726_v59, %v2725_v48  ;;  %v2768_v1 = vpack.c.bf16 %v2728_v60, %v2727_v50 }
 0x2a6   : > { %v2753_v15 = vrot.slane %v2728_v60, 1  ;;  %v2752_v28 = vrot.slane %v2726_v59, 1 }
 0x2a7   : > { %v2738_v39 = vsel %vm656_vm3, %v2734_v61, %v2737_v62  ;;  %v2744_v2 = vsel %vm656_vm3, %v2726_v59, %v2734_v61  ;;  %v2783_v3 = vunpack.c.l.b16 %v2767_v0  ;;  %v2785_v4 = vunpack.c.l.b16 %v2768_v1 }
 0x2a8   : > { %v2784_v5 = vunpack.c.h.b16 %v2767_v0  ;;  %v2786_v7 = vunpack.c.h.b16 %v2768_v1  ;;  %v2746_v11 = vmul.f32 %v5619_v20, %v2744_v2  ;;  %v2766_v56 = vpack.c.bf16 %v2738_v39, %v2736_v40 }
 0x2a9   : > { %v2787_v13 = vpack.c.b16 %v2785_v4, %v2783_v3  ;;  %v2760_v30 = vsel %vm665_vm0, %v2753_v15, %v2728_v60  ;;  %v2759_v20 = vsel %vm665_vm0, %v2750_v26, %v2727_v50  ;;  %v2754_v9 = vsel %vm665_vm0, %v2752_v28, %v2753_v15 }
 0x2aa   : > { %v2788_v38 = vpack.c.b16 %v2786_v7, %v2784_v5  ;;  %v2765_v14 = vpack.c.bf16 %v2746_v11, %v2745_v12  ;;  %v2775_v17 = vunpack.c.l.b16 %v2766_v56  ;;  %v2776_v22 = vunpack.c.h.b16 %v2766_v56 }
 0x2ab   : > { %3225 = vmatmul.bf16.vlgmr.msrb.gmra.mxu1 %v2787_v13  ;;  %v2764_v19 = vmul.f32 %v5624_v24, %v2760_v30  ;;  %v2763_v32 = vmul.f32 %v5624_v24, %v2759_v20  ;;  %v2769_v35 = vpack.c.bf16 %v2754_v9, %v2751_v34  ;;  %v4955_v24 = vld [vmem:[%s5854_s6] ss:$0 sm:$0xff] }
 0x2ac   : > { %3239 = vmatmul.bf16.vlgmr.msrb.gmra.mxu2 %v2788_v38  ;;  %v2773_v16 = vunpack.c.l.b16 %v2765_v14  ;;  %v2774_v18 = vunpack.c.h.b16 %v2765_v14 }
 0x2ad   : > { %v2770_v33 = vpack.c.bf16 %v2764_v19, %v2763_v32  ;;  %v2793_v41 = vunpack.c.l.b16 %v2769_v35  ;;  %v2794_v42 = vunpack.c.h.b16 %v2769_v35 }
 0x2ae   : > { %v2777_v27 = vpack.c.b16 %v2775_v17, %v2773_v16  ;;  %v2778_v29 = vpack.c.b16 %v2776_v22, %v2774_v18 }
 0x2af   : > { %v2795_v36 = vunpack.c.l.b16 %v2770_v33  ;;  %v2796_v37 = vunpack.c.h.b16 %v2770_v33 }
 0x2b0   : > { %3197 = vmatmul.bf16.vlgmr.msra.gmra.mxu3 %v2777_v27  ;;  %3211 = vmatmul.bf16.vlgmr.msrb.gmra.mxu0 %v2778_v29 }
 0x2b1   : > { %v2797_v21 = vpack.c.b16 %v2795_v36, %v2793_v41  ;;  %v2798_v43 = vpack.c.b16 %v2796_v37, %v2794_v42 }
 0x2c0   : > { %3253 = vmatmul.bf16.vlgmr.msrb.gmra.mxu3 %v2797_v21  ;;  %3267 = vmatmul.bf16.vlgmr.msra.gmra.mxu0 %v2798_v43 }
 0x328   : > { %v3226_v46 = vpop.f32.mrf.mxu1 }
 0x32d   : > { %v3212_v8 = vpop.f32.mrf.mxu0 }
 0x32f   : > { %v3240_v48 = vpop.f32.mrf.mxu2 }
 0x330   : > { %v3228_v54 = vpop.f32.mrf.mxu1 }
 0x333   : > { %v3198_v63 = vpop.f32.mrf.mxu3 }
 0x334   : > { %v3199_v6 = vadd.f32 %v4955_v24, %v3198_v63 }
 0x335   : > { %v3214_v44 = vpop.f32.mrf.mxu0 }
 0x336   : > { %v3213_v45 = vadd.f32 %v3212_v8, %v3199_v6 }
 0x337   : > { %v3242_v58 = vpop.f32.mrf.mxu2 }
 0x338   : > { %v3227_v10 = vadd.f32 %v3226_v46, %v3213_v45 }
 0x33a   : > { %v3241_v50 = vadd.f32 %v3240_v48, %v3227_v10 }
 0x33b   : > { %v3200_v25 = vpop.f32.mrf.mxu3 }
 0x33c   : > { %v3201_v47 = vadd.f32 %v4955_v24, %v3200_v25 }
 0x33d   : > { %v3268_v51 = vpop.f32.mrf.mxu0 }
 0x33e   : > { %v3215_v49 = vadd.f32 %v3214_v44, %v3201_v47 }
 0x340   : > { %v3229_v57 = vadd.f32 %v3228_v54, %v3215_v49 }
 0x342   : > { %v3243_v59 = vadd.f32 %v3242_v58, %v3229_v57 }
 0x343   : > { %v3254_v52 = vpop.f32.mrf.mxu3 }
 0x344   : > { %v3255_v53 = vadd.f32 %v3254_v52, %v3241_v50 }
 0x345   : > { %v3270_v62 = vpop.f32.mrf.mxu0 }
 0x346   : > { %v3269_v55 = vadd.f32 %v3268_v51, %v3255_v53 }
 0x348   : > { %3273 = vst [vmem:[%s615_s16] sm:$0xff] %v3269_v55 }
 0x34b   : > { %v3256_v60 = vpop.f32.mrf.mxu3 }
 0x34c   : > { %v3257_v61 = vadd.f32 %v3256_v60, %v3243_v59 }
 0x34e   : > { %v3271_v0 = vadd.f32 %v3270_v62, %v3257_v61 }
 0x350   : > { %3274 = vst [vmem:[%s615_s16 + $0x8] sm:$0xff] %v3271_v0 }
 0x351   : > { %5253 = shalt.err (!%p5250_p5)
}
 0x352   : > { %s5328_s19 = smov 128   ;;  %s5329_s17 = smov 8  }
 0x353   : > { %4854 = dma.vmem_to_hbm [thread:$0]  (%p5515_p0), %s3289_s12, 256, %s3291_s18, %s3276_s15, %s5328_s19, %s5328_s19, %s5329_s17  }
 0x354 PF: > { %s3305_s6 = sand.u32 1, %s5300_s25   ;;  %p5856_p10 = scmp.ge.s32.totalorder %s5312_s28, 2 }
 0x355   : > { %s3306_s20 = scalar_lea.sflag [#allocation4], %s3305_s6 }
 0x356   : > { %p4886_p11 = pnand %p5856_p10, %p5521_p6 }
 0x358   : > { %p4887_p12 = pneg %p4886_p11 }
 0x35a   : > { %5295 = dma.done.wait (%p4887_p12), %s3306_s20, 256  }
 0x35b   : > { %5297 = vsyncadd (%p4887_p12), %s3306_s20, 4294967040  ;;  %p32_p2 = scmp.ge.s32.totalorder %s5491_s13, 4   ;;  %s5857_s25 = smov %s5304_s26 }
 0x35c   : > { %s5858_s26 = smov %s5308_s27  ;;  %s5859_s27 = smov %s5503_s30 }
 0x35d   : > { %s5860_s28 = smov %s5491_s13  ;;  %34 = sbr.rel (!%p32_p2) target bundleno = 22 (0x16), region = 158 }
 0x362   :  { %3312 = vsyncpa [#allocation3], 1 }
 0x363   :  { %3314 = vsyncpa [#allocation3 + $0x1], 1 }
 0x364   :  { %3315 = vsyncpa [#allocation6], 1 }
 0x365   :  { %3317 = vsyncpa [#allocation6 + $0x1], 1 }
 0x366   :  { %3318 = vsyncpa [#allocation9], 1 }
 0x367   :  { %3319 = vsyncpa [#allocation12], 1 }
 0x368   :  { %3320 = vsyncpa [#allocation15], 1 }
 0x369   :  { %3321 = vsyncpa [#allocation4], 1 }
 0x36a   :  { %3323 = vsyncpa [#allocation4 + $0x1], 1 }

</bundles_post_ra>
